<compile_context>
chip_gen: v7x
topology: tpu7x:2x2x1
jax: 0.10.0
libtpu: 0.0.40
codegen_flags: <defaults>
</compile_context>

<pallas_src>
import math
import functools

import jax
import jax.numpy as jnp
from jax.experimental import pallas as pl
from jax.experimental.pallas import tpu as pltpu


def _default_vmem_limit():
    # 75% of physical VMEM, capped at 96 MiB (v5e/v6e: 128 MiB, v7x: 64 MiB).
    try:
        cap = pltpu.get_tpu_info().vmem_capacity_bytes
        return int(min(96 * 1024 * 1024, cap * 3 // 4))
    except Exception:
        return 32 * 1024 * 1024


_VMEM_LIMIT_BYTES = _default_vmem_limit()


def _round_up(a, b):
    return ((a + b - 1) // b) * b


# ----------------------------------------------------------------------------
# Fused linear Pallas kernel
#   optional prologue : LayerNorm (one-pass stats, full-K block), leaky_relu
#                       -> computed once per row tile, cached in VMEM scratch
#   matmul            : bf16 operands, f32 accumulation (MXU)
#   optional epilogue : bias, gelu/tanh, residual add
# ----------------------------------------------------------------------------
def _fused_linear_kernel(*refs, has_ln, in_act, has_bias, out_act,
                         has_residual, use_cache):
    refs = list(refs)
    x_ref = refs.pop(0)
    g_ref = refs.pop(0) if has_ln else None
    bln_ref = refs.pop(0) if has_ln else None
    w_ref = refs.pop(0)
    b_ref = refs.pop(0) if has_bias else None
    r_ref = refs.pop(0) if has_residual else None
    o_ref = refs.pop(0)
    xc_ref = refs.pop(0) if use_cache else None

    def prologue():
        x = x_ref[...].astype(jnp.float32)
        if has_ln:
            # One-pass stats: mean = E[x], var = E[x^2] - mean^2 (all f32).
            mean = jnp.mean(x, axis=-1, keepdims=True)
            var = jnp.mean(x * x, axis=-1, keepdims=True) - mean * mean
            x = (x - mean) * jax.lax.rsqrt(var + 1e-5)
            x = x * g_ref[...].astype(jnp.float32) + bln_ref[...].astype(jnp.float32)
        if in_act == "leaky_relu":
            # TODO(synk): torch default negative_slope=0.01; verify vs the real upsampler.
            x = jnp.where(x > 0, x, 0.01 * x)
        return x.astype(jnp.bfloat16)

    if use_cache:
        # Prologue is computed only on the first output-column tile of each row
        # tile; the j grid axis is "arbitrary" (sequential) so the cache is
        # valid for every subsequent j.
        @pl.when(pl.program_id(1) == 0)
        def _():
            xc_ref[...] = prologue()
        xb = xc_ref[...]
    else:
        if has_ln or in_act is not None:
            xb = prologue()
        else:
            xb = x_ref[...].astype(jnp.bfloat16)

    y = jnp.dot(xb, w_ref[...].astype(jnp.bfloat16),
                preferred_element_type=jnp.float32)

    if has_bias:
        y = y + b_ref[...].astype(jnp.float32)
    if out_act == "gelu":
        # TODO(synk): torch nn.GELU defaults to exact erf; tanh approximation used here.
        y = jax.nn.gelu(y, approximate=True)
    elif out_act == "tanh":
        y = jnp.tanh(y)
    if has_residual:
        y = y + r_ref[...].astype(jnp.float32)
    o_ref[...] = y.astype(o_ref.dtype)


def fused_linear(x, w, *, bias=None, ln=None, residual=None, in_act=None,
                 out_act=None, out_dtype=jnp.bfloat16):
    """y = epilogue( prologue(x) @ w + bias ) [+ residual], one pallas_call.

    x: (M, K) bf16/f32, w: (K, N) bf16, bias: (N,) f32, ln: (gamma, beta) each
    (K,) f32, residual: (M, N) bf16/f32.  K is reduced in a single full-K step
    (required for the fused LayerNorm prologue).  Rows are padded to a
    sublane/tile multiple and the result is sliced back.
    """
    M, K = x.shape
    K2, N = w.shape
    assert K == K2

    # Row tiling: cap the x block at 256 rows; pad M to a multiple of the tile.
    if M >= 256:
        tm = 256
        m_pad = _round_up(M, tm)
    else:
        m_pad = max(_round_up(M, 8), 8)
        tm = m_pad
    if m_pad != M:
        x = jnp.pad(x, ((0, m_pad - M), (0, 0)))
        if residual is not None:
            residual = jnp.pad(residual, ((0, m_pad - M), (0, 0)))

    # Column tiling: <=256 so even the 512-wide head keeps >=2 parallel blocks.
    if N % 256 == 0:
        tn = 256
    elif N % 128 == 0:
        tn = 128
    else:
        tn = N
    tn = min(tn, N)
    grid_m, grid_n = m_pad // tm, N // tn

    has_prologue = (ln is not None) or (in_act is not None)
    use_cache = has_prologue and grid_n > 1

    inputs = [x]
    in_specs = [pl.BlockSpec((tm, K), lambda i, j: (i, 0))]
    if ln is not None:
        g, bln = ln
        inputs += [g.reshape(1, K).astype(jnp.float32),
                   bln.reshape(1, K).astype(jnp.float32)]
        in_specs += [pl.BlockSpec((1, K), lambda i, j: (0, 0))] * 2
    inputs.append(w)
    in_specs.append(pl.BlockSpec((K, tn), lambda i, j: (0, j)))
    if bias is not None:
        inputs.append(bias.reshape(1, N).astype(jnp.float32))
        in_specs.append(pl.BlockSpec((1, tn), lambda i, j: (0, j)))
    if residual is not None:
        inputs.append(residual)
        in_specs.append(pl.BlockSpec((tm, tn), lambda i, j: (i, j)))

    scratch = [pltpu.VMEM((tm, K), jnp.bfloat16)] if use_cache else []

    kernel = functools.partial(
        _fused_linear_kernel,
        has_ln=ln is not None,
        in_act=in_act,
        has_bias=bias is not None,
        out_act=out_act,
        has_residual=residual is not None,
        use_cache=use_cache,
    )

    # With the prologue cache the j axis must run sequentially per row tile.
    dims = ("parallel", "arbitrary") if use_cache else ("parallel", "parallel")

    out = pl.pallas_call(
        kernel,
        out_shape=jax.ShapeDtypeStruct((m_pad, N), out_dtype),
        grid=(grid_m, grid_n),
        in_specs=in_specs,
        out_specs=pl.BlockSpec((tm, tn), lambda i, j: (i, j)),
        scratch_shapes=scratch,
        compiler_params=pltpu.CompilerParams(
            dimension_semantics=dims,
            vmem_limit_bytes=_VMEM_LIMIT_BYTES,
        ),
    )(*inputs)

    return out[:M] if m_pad != M else out


# ----------------------------------------------------------------------------
# JAX glue: channels-last ConvTranspose1d overlap-add (tap-major taps,
# grouped contiguous shifted adds + reshape, bias folded in, no scatters)
# ----------------------------------------------------------------------------
def overlap_add_cl(z, stride, kernel, pad, bias):
    """z: (B, T, k, C) tap-major -> (B, (T-1)*stride + k - 2*pad, C) + bias."""
    B, T, k, C = z.shape
    assert k % stride == 0, "overlap-add fast path needs kernel % stride == 0"
    groups = k // stride
    M = T + groups - 1
    acc = jnp.zeros((B, M, stride, C), jnp.float32)
    for c in range(groups):  # k // stride contiguous slab adds (2 for k=4,s=2)
        acc = acc.at[:, c:c + T].add(
            z[:, :, c * stride:(c + 1) * stride, :].astype(jnp.float32))
    full = acc.reshape(B, M * stride, C)
    out_len = (T - 1) * stride + kernel - 2 * pad
    return full[:, pad:pad + out_len, :] + bias[None, None, :].astype(jnp.float32)


# ----------------------------------------------------------------------------
# Decoder module (synthetic deterministic parameters)
# ----------------------------------------------------------------------------
class DecoderPallas:
    CODE_DIM = 2048
    HIDDEN = 1024
    N_BLOCKS = 2
    NUM_QUANTIZERS = 4
    CODEBOOK_SIZE = 64

    def __init__(self, sample_rate, hop_length, upsample_factors, kernel_sizes, key):
        total_ups = math.prod(upsample_factors) if upsample_factors else 1
        if sample_rate // hop_length // total_ups != 50:
            raise ValueError("hop_length / upsample_factors do not match sample_rate")
        self.sample_rate = sample_rate
        self.hop_length = hop_length
        self.upsample_factors = upsample_factors
        self.kernel_sizes = kernel_sizes

        keys = iter(jax.random.split(key, 64))
        f32, bf16 = jnp.float32, jnp.bfloat16

        def norm(k, shape, scale, dtype):
            return (jax.random.normal(k, shape, dtype=f32) * scale).astype(dtype)

        # RVQ codebooks: (Q, V, 2048) bf16, kept flattened for a single gather.
        cb = norm(next(keys),
                  (self.NUM_QUANTIZERS, self.CODEBOOK_SIZE, self.CODE_DIM), 0.02, bf16)
        self.codebooks_flat = cb.reshape(self.NUM_QUANTIZERS * self.CODEBOOK_SIZE,
                                         self.CODE_DIM)
        # TODO(synk): the gather+sum could be fully fused into fc_post_a via a
        # PrefetchScalarGridSpec index path with the 1 MiB codebook resident in
        # VMEM; kept as a single XLA gather for robustness.

        # fc_post_a: Linear(2048, 1024)
        self.fc_w = norm(next(keys), (self.CODE_DIM, self.HIDDEN),
                         1.0 / math.sqrt(self.CODE_DIM), bf16)
        self.fc_b = jnp.zeros((self.HIDDEN,), f32)

        # backbone blocks: LN + FFN residual
        self.blocks = []
        for _ in range(self.N_BLOCKS):
            self.blocks.append(
                dict(
                    ln_g=jnp.ones((self.HIDDEN,), f32),
                    ln_b=jnp.zeros((self.HIDDEN,), f32),
                    w1=norm(next(keys), (self.HIDDEN, self.HIDDEN),
                            1.0 / math.sqrt(self.HIDDEN), bf16),
                    b1=jnp.zeros((self.HIDDEN,), f32),
                    w2=norm(next(keys), (self.HIDDEN, self.HIDDEN),
                            1.0 / math.sqrt(self.HIDDEN), bf16),
                    b2=jnp.zeros((self.HIDDEN,), f32),
                )
            )
        self.final_ln_g = jnp.ones((self.HIDDEN,), f32)
        self.final_ln_b = jnp.zeros((self.HIDDEN,), f32)

        # upsampler stages: ConvTranspose1d(C_in -> C_in//2, kernel k, stride u,
        # pad (k-u)//2).  Weight stored tap-major: (C_in, k * C_out) so the
        # matmul output reshapes to (B, T, k, C_out) with no transpose.
        # TODO(synk): converting a real torch ConvTranspose1d (C_in, C_out, K)
        # weight requires a permute to this tap-major layout.
        self.up_stages = []
        c_in = self.HIDDEN
        for u, ks in zip(upsample_factors, kernel_sizes):
            c_out = c_in // 2
            self.up_stages.append(
                dict(
                    w=norm(next(keys), (c_in, ks * c_out),
                           1.0 / math.sqrt(c_in * ks), bf16),
                    b=jnp.zeros((c_out,), f32),
                    c_out=c_out,
                    k=ks,
                    stride=u,
                    pad=(ks - u) // 2,
                )
            )
            c_in = c_out

        # head: per-upsampled-frame Linear(C, hop_length) + tanh
        # output width padded to a lane multiple for unmasked (lane-dense) stores.
        head_n = ((hop_length + 127) // 128) * 128
        hw = norm(next(keys), (c_in, hop_length), 1.0 / math.sqrt(c_in), f32)
        self.head_w = jnp.pad(hw, ((0, 0), (0, head_n - hop_length))).astype(bf16)
        self.head_b = jnp.zeros((head_n,), f32)
        self.head_n = head_n

    def __call__(self, vq_codes):
        # vq_codes: (B, Q, T) int32  (a (B, T) input is unsqueezed like the torch code)
        if vq_codes.ndim == 2:
            vq_codes = vq_codes[:, None, :]
        codes = jnp.transpose(vq_codes, (0, 2, 1))  # (B, T, Q)
        B, T, Q = codes.shape

        # quantizer.get_output_from_indices: RVQ lookup + sum, collapsed into a
        # single gather on the flattened (Q*V, 2048) codebook (bf16 output).
        offsets = (jnp.arange(Q, dtype=jnp.int32) * self.CODEBOOK_SIZE)[None, None, :]
        flat_idx = (codes + offsets).reshape(-1)                       # (B*T*Q,)
        emb = jnp.take(self.codebooks_flat, flat_idx, axis=0)          # (B*T*Q, 2048)
        emb = emb.reshape(B * T, Q, self.CODE_DIM).astype(jnp.float32)
        emb = emb.sum(axis=1).astype(jnp.bfloat16)                     # (B*T, 2048)

        # fc_post_a
        h = fused_linear(emb, self.fc_w, bias=self.fc_b)               # bf16 (B*T, 1024)

        # backbone: 2 pallas_calls per block (LN fused+cached in matmul-1,
        # residual fused into matmul-2's epilogue)
        for blk in self.blocks:
            y = fused_linear(h, blk["w1"], bias=blk["b1"],
                             ln=(blk["ln_g"], blk["ln_b"]), out_act="gelu")
            h = fused_linear(y, blk["w2"], bias=blk["b2"], residual=h)

        # final backbone LayerNorm: fused into whichever kernel consumes h next.
        pending_ln = (self.final_ln_g, self.final_ln_b)

        # upsampler (channels-last throughout, bf16 activations)
        x = h  # (B*T, HIDDEN) bf16
        Tc = T
        for st in self.up_stages:
            z = fused_linear(x, st["w"], ln=pending_ln, in_act="leaky_relu")
            pending_ln = None
            z = z.reshape(B, Tc, st["k"], st["c_out"])                 # tap-major
            y = overlap_add_cl(z, st["stride"], st["k"], st["pad"], st["b"])
            Tc = y.shape[1]
            x = y.astype(jnp.bfloat16).reshape(B * Tc, st["c_out"])

        # head -> waveform (lane-padded output, sliced back to hop_length)
        audio = fused_linear(x, self.head_w, bias=self.head_b,
                             ln=pending_ln, out_act="tanh", out_dtype=jnp.float32)
        audio = audio[:, : self.hop_length].reshape(B, Tc * self.hop_length)
        return audio[:, None, :]  # (B, 1, samples)


# ----------------------------------------------------------------------------
if __name__ == "__main__":
    key = jax.random.PRNGKey(0)
    k_param, k_codes = jax.random.split(key)

    # sample_rate // hop_length // prod(upsample_factors) must equal 50
    decoder = DecoderPallas(
        sample_rate=48000,
        hop_length=480,
        upsample_factors=[2],
        kernel_sizes=[4],
        key=k_param,
    )

    B, Q, T = 2, DecoderPallas.NUM_QUANTIZERS, 8
    vq_codes = jax.random.randint(
        k_codes, (B, Q, T), 0, DecoderPallas.CODEBOOK_SIZE, dtype=jnp.int32
    )

    audio = decoder(vq_codes)
    audio = jax.block_until_ready(audio)

    expected_samples = T * 2 * 480  # frames * upsample * hop_length
    assert audio.shape == (B, 1, expected_samples), audio.shape
    assert bool(jnp.all(jnp.isfinite(audio)))
    print("KERNEL_OK")
</pallas_src>

<mosaic_0001>
module attributes {stable_mosaic.version = 11 : i64} {
  func.func @_fused_linear_kernel(%arg0: i32, %arg1: i32, %arg2: memref<16x2048xbf16, #tpu.memory_space<vmem>>, %arg3: memref<2048x256xbf16, #tpu.memory_space<vmem>>, %arg4: memref<1x256xf32, #tpu.memory_space<vmem>>, %arg5: memref<16x256xbf16, #tpu.memory_space<vmem>>) attributes {dimension_semantics = [#tpu.dimension_semantics<parallel>, #tpu.dimension_semantics<parallel>], iteration_bounds = array<i64: 1, 4>, scalar_prefetch = 0 : i64, scratch_operands = 0 : i64, tpu.core_type = #tpu.core_type<tc>, window_params = [{transform_indices = @transform_0, window_bounds = array<i64: 16, 2048>}, {transform_indices = @transform_1, window_bounds = array<i64: 2048, 256>}, {transform_indices = @transform_2, window_bounds = array<i64: 1, 256>}, {transform_indices = @transform_3, window_bounds = array<i64: 16, 256>}]} {
    %c0 = arith.constant 0 : index
    %c0_0 = arith.constant 0 : index
    %0 = vector.load %arg2[%c0, %c0_0] : memref<16x2048xbf16, #tpu.memory_space<vmem>>, vector<16x2048xbf16>
    %c0_1 = arith.constant 0 : index
    %c0_2 = arith.constant 0 : index
    %1 = vector.load %arg3[%c0_1, %c0_2] : memref<2048x256xbf16, #tpu.memory_space<vmem>>, vector<2048x256xbf16>
    %cst = arith.constant dense<0.000000e+00> : vector<16x256xf32>
    %2 = tpu.matmul %0, %1, %cst {dimension_numbers = #tpu.dot_dimension_numbers<[1], [0], [0], [1], [0, 0, 1, 1], [], []>} : vector<16x2048xbf16>, vector<2048x256xbf16>, vector<16x256xf32> -> vector<16x256xf32>
    %c0_3 = arith.constant 0 : index
    %c0_4 = arith.constant 0 : index
    %3 = vector.load %arg4[%c0_3, %c0_4] : memref<1x256xf32, #tpu.memory_space<vmem>>, vector<1x256xf32>
    %4 = vector.broadcast %3 : vector<1x256xf32> to vector<16x256xf32>
    %5 = arith.addf %2, %4 : vector<16x256xf32>
    %6 = arith.truncf %5 : vector<16x256xf32> to vector<16x256xbf16>
    %c0_5 = arith.constant 0 : index
    %c0_6 = arith.constant 0 : index
    %7 = vector.load %arg5[%c0_5, %c0_6] : memref<16x256xbf16, #tpu.memory_space<vmem>>, vector<16x256xbf16>
    tpu.vector_store %arg5[%c0_5, %c0_6], %6 {strides = array<i32>} : memref<16x256xbf16, #tpu.memory_space<vmem>>, vector<16x256xbf16>,
    return
  }
  func.func @transform_0(%arg0: i32, %arg1: i32) -> (i32, i32) {
    %c0_i32 = arith.constant 0 : i32
    %c0_i32_0 = arith.constant 0 : i32
    return %arg0, %c0_i32 : i32, i32
  }
  func.func @transform_1(%arg0: i32, %arg1: i32) -> (i32, i32) {
    %c0_i32 = arith.constant 0 : i32
    %c0_i32_0 = arith.constant 0 : i32
    return %c0_i32, %arg1 : i32, i32
  }
  func.func @transform_2(%arg0: i32, %arg1: i32) -> (i32, i32) {
    %c0_i32 = arith.constant 0 : i32
    %c0_i32_0 = arith.constant 0 : i32
    return %c0_i32, %arg1 : i32, i32
  }
  func.func @transform_3(%arg0: i32, %arg1: i32) -> (i32, i32) {
    %c0_i32 = arith.constant 0 : i32
    return %arg0, %arg1 : i32, i32
  }
}

</mosaic_0001>

<bundles_post_ra>
// kernel: tpu_custom_call.1
= control target key start
LH: loop header
LB: loop body
LE: loop exit
PB: predicated region body
PF: predicated region fallthrough
CT: control target
= control target key end

     0   :  { %s3977_s0 = inlined_call_operand.hbm [shape: bf16[16,2048], index: 0, kind: input, shape index: {}]   ;;  %s3978_s1 = inlined_call_operand.hbm [shape: bf16[2048,1024], index: 1, kind: input, shape index: {}]   ;;  %s3979_s2 = inlined_call_operand.hbm [shape: f32[1,1024], index: 2, kind: input, shape index: {}]   ;;  %s3980_s3 = inlined_call_operand.hbm [shape: bf16[16,1024], index: 3, kind: output, shape index: {}]  }
   0x1   :  { %3989 = sst [smem:[#allocation13_spill]] %s3978_s1 }
   0x2   :  { %8 = vsyncpa [#allocation3], 0 }
   0x3   :  { %9 = vsyncpa [#allocation6], 0 }
   0x4   :  { %11 = vsyncpa [#allocation6 + $0x1], 0 }
   0x5   :  { %12 = vsyncpa [#allocation4], 0 }
   0x6   :  { %14 = vsyncpa [#allocation4 + $0x1], 0  ;;  %s3414_s12 = smov 0   ;;  %s3416_s13 = smov 0  }
   0x7   :  { %s3418_s14 = smov 0   ;;  %s3420_s15 = smov 0  }
   0x8   :  { %s3422_s16 = smov 0   ;;  %s3424_s17 = smov 0  }
   0x9 LB: > { %s29_s18 = sadd.s32 1, %s3376_s16  ;;  %s65_s19 = sadd.s32 1, %s3368_s14  ;;  %s3380_s17 = sphi %s3424_s17, %s20_s17   ;;  %s3376_s16 = sphi %s3422_s16, %s4012_s16   ;;  %s3372_s15 = sphi %s3420_s15, %s4011_s15   ;;  %s3368_s14 = sphi %s3418_s14, %s4010_s14   ;;  %s3364_s13 = sphi %s3416_s13, %s4009_s13   ;;  %s3360_s12 = sphi %s3414_s12, %s4008_s12  }
   0xa   : > { %p30_p0 = scmp.ge.s32.totalorder %s29_s18, 4  ;;  %p72_p1 = scmp.ne.s32.totalorder %s3368_s14, %s3364_s13 }
   0xb   : > { %p73_p2 = scmp.eq.s32.totalorder %s3380_s17, 0  ;;  %p2762_p4 = scmp.lt.s32.totalorder %s3380_s17, 4 }
   0xc   : > { %s4014_s18 = smov (%p30_p0, %s29_s18), 0  ;;  %s173_s21 = sand.u32 1, %s3380_s17  }
   0xd   : > { %3990 = sst [smem:[#allocation12_spill]] %s4014_s18  ;;  %p74_p3 = por %p73_p2, %p72_p1 }
   0xe   : > { %s62_s20 = ssub.s32 %s3376_s16, %s4014_s18  ;;  %s175_s22 = sand.u32 1, %s3368_s14  }
   0xf   : > { %p63_p5 = scmp.eq.s32.totalorder %s62_s20, 0  ;;  %s2699_s23 = sshll.u32 %s3376_s16, 7 }
  0x10   : > { %s2409_s25 = sshll.u32 %s175_s22, 11  ;;  %s3991_s1 = sld [smem:[#allocation13_spill]] }
  0x11   : > { %s3461_s24 = scalar_select %p63_p5, %s3368_s14, %s65_s19  }
  0x12   : > { %p3470_p6 = pnand %p2762_p4, %p74_p3  ;;  %s177_s30 = scalar_lea.vmem [#allocation5], %s2409_s25 }
  0x13   : > { %s184_s4 = sshll.u32 %s177_s30, 4  ;;  %s3476_s5 = scalar_lea.sflag [#allocation6], %s173_s21  ;;  %s3474_s4 = int_to_ptr.vmem [resolvable:$true] %s184_s4 }
  0x14   : > { %s3992_s29 = scalar_select %p3470_p6, 1, 0 }
  0x15   : > { %p3983_p8 = pneg %p3470_p6 }
  0x16   : > { %s3468_s28 = scalar_lea.hbm %s3991_s1, %s2699_s23  ;;  %s3211_s9 = scalar_lea.hbm %s3991_s1, 131072 }
  0x17   : > { %s3206_s6 = scalar_lea.hbm %s3468_s28, 32768  ;;  %p3212_p11 = scmp.lt.u32.totalorder %s3468_s28, %s3991_s1 }
  0x18   : > { %p3207_p7 = scmp.ne.s32.totalorder %s3468_s28, %s3206_s6  ;;  %p3213_p12 = scmp.lt.u32.totalorder %s3211_s9, %s3206_s6 }
  0x19   : > { %p3215_p0 = scmp.lt.u32.totalorder %s3206_s6, %s3468_s28 }
  0x1a   : > { %p3209_p9 = pnand %p3983_p8, %p3207_p7  ;;  %p3214_p13 = por %p3213_p12, %p3212_p11 }
  0x1c   : > { %p3210_p10 = pneg %p3209_p9  ;;  %p3216_p2 = por %p3215_p0, %p3214_p13 }
  0x1e   : > { %p3217_p3 = pnand %p3216_p2, %p3210_p10 }
  0x20   : > { %3220 = shalt.err (!%p3217_p3)
}
  0x21   : > { %s3221_s19 = scalar_lea.vmem %s3474_s4, 32768  ;;  %s3382_s20 = smov [#allocation5]  }
  0x22   : > { %p3222_p4 = scmp.ne.s32.totalorder %s3474_s4, %s3221_s19  ;;  %s3226_s21 = sshll.u32 %s3382_s20, 4  ;;  %s3227_s21 = int_to_ptr.vmem [resolvable:$false] %s3226_s21 }
  0x23   : > { %s3228_s23 = scalar_lea.vmem %s3227_s21, 65536  ;;  %p3229_p9 = scmp.lt.s32.totalorder %s3474_s4, %s3227_s21 }
  0x24   : > { %p3224_p5 = pnand %p3222_p4, %p3983_p8  ;;  %p3230_p11 = scmp.lt.s32.totalorder %s3228_s23, %s3221_s19 }
  0x26   : > { %p3225_p7 = pneg %p3224_p5  ;;  %p3231_p12 = por %p3230_p11, %p3229_p9 }
  0x28   : > { %p3232_p13 = pnand %p3231_p12, %p3225_p7 }
  0x2a   : > { %3235 = shalt.err (!%p3232_p13)
}
  0x2b   : > { %s3383_s25 = smov 512   ;;  %s3384_s26 = smov 128  }
  0x2c   : > { %s3385_s27 = smov 8   ;;  %s3505_s30 = sadd.s32 4294967295, %s3380_s17  }
  0x2d   : > { %2753 = dma.hbm_to_vmem [thread:$0]  (!%p3470_p6), %s3468_s28, 32768, %s3474_s4, %s3476_s5, %s3383_s25, %s3384_s26, %s3385_s27  }
  0x2e   : > { %s2405_s6 = sadd.s32 4294967294, %s3380_s17   ;;  %p78_p10 = scmp.ne.s32.totalorder %s3364_s13, %s3360_s12 }
  0x2f   : > { %p3982_p0 = scmp.eq.s32.totalorder %s3505_s30, 0  ;;  %p130_p2 = scmp.eq.s32.totalorder %s3505_s30, 3 }
  0x30   : > { %p136_p3 = scmp.eq.s32.totalorder %s2405_s6, 3  ;;  %p2406_p5 = scmp.ge.s32.totalorder %s3380_s17, 1 }
  0x31   : > { %p3514_p4 = por %p3982_p0, %p78_p10  ;;  %p3522_p7 = por %p130_p2, %p72_p1 }
  0x32   : > { %p3526_p9 = por %p136_p3, %p78_p10  ;;  %p143_p11 = scmp.lt.s32.totalorder %s3380_s17, 5 }
  0x33   : > { %s3993_s7 = scalar_select %p3514_p4, 1, 0 }
  0x34   : > { %s3994_s28 = scalar_select %p3522_p7, 1, 0 }
  0x35   : > { %s3995_s4 = scalar_select %p3526_p9, 1, 0 }
  0x36   : > { %p3531_p12 = pnand %p2406_p5, %p143_p11  ;;  %s3386_s9 = smov [#allocation2]  }
  0x37   : > { %s159_s10 = sshll.u32 %s3386_s9, 4  ;;  %s2412_s11 = sshll.u32 %s175_s22, 1  ;;  %s3535_s10 = int_to_ptr.vmem [resolvable:$true] %s159_s10 }
  0x38   : > { %s3996_s8 = scalar_select %p3531_p12, 1, 0 }
  0x39   : > { %p2746_p13 = pneg %p3531_p12  ;;  %s2700_s19 = sshll.u32 %s3376_s16, 5 }
  0x3a   : > { %s3551_s25 = scalar_lea.hbm %s3979_s2, %s2700_s19  ;;  %s198_s26 = scalar_lea.vmem [#allocation7], %s2412_s11 }
  0x3b   : > { %p3544_p1 = pnand %p2746_p13, %p3982_p0  ;;  %s206_s27 = sshll.u32 %s198_s26, 4  ;;  %s3553_s27 = int_to_ptr.vmem [resolvable:$true] %s206_s27 }
  0x3c   : > { %s3236_s22 = scalar_lea.hbm %s3977_s0, 2048 }
  0x3d   : > { %p3237_p10 = scmp.ne.s32.totalorder %s3977_s0, %s3236_s22  ;;  %p3238_p2 = pneg %p3544_p1 }
  0x3e   : > { %p3243_p11 = scmp.lt.u32.totalorder %s3236_s22, %s3977_s0 }
  0x3f   : > { %p3239_p3 = pnand %p3238_p2, %p3237_p10 }
  0x41   : > { %p3240_p5 = pneg %p3239_p3 }
  0x43   : > { %p3245_p13 = pnand %p3243_p11, %p3240_p5 }
  0x45   : > { %3248 = shalt.err (!%p3245_p13)
}
  0x46   : > { %s3249_s11 = scalar_lea.vmem %s3535_s10, 2048  ;;  %p3257_p7 = scmp.lt.s32.totalorder %s3535_s10, %s3535_s10 }
  0x47   : > { %p3250_p0 = scmp.ne.s32.totalorder %s3535_s10, %s3249_s11  ;;  %p3258_p4 = scmp.lt.s32.totalorder %s3249_s11, %s3249_s11 }
  0x49   : > { %p3252_p8 = pnand %p3250_p0, %p3238_p2  ;;  %p3259_p12 = por %p3258_p4, %p3257_p7 }
  0x4b   : > { %p3253_p9 = pneg %p3252_p8 }
  0x4d   : > { %p3260_p6 = pnand %p3259_p12, %p3253_p9 }
  0x4f   : > { %3263 = shalt.err (!%p3260_p6)
}
  0x50   : > { %s3387_s1 = smov 1024   ;;  %s3388_s18 = smov 64  }
  0x51   : > { %2749 = dma.hbm_to_vmem [thread:$0]  (!%p3544_p1), %s3977_s0, 2048, %s3535_s10, [#allocation3], %s3387_s1, %s3387_s1, %s3388_s18  }
  0x52   : > { %s3264_s6 = scalar_lea.hbm %s3551_s25, 32  ;;  %p3998_p0 = scmp.ne.s32.totalorder %s3992_s29, 0 }
  0x53   : > { %p3265_p8 = scmp.ne.s32.totalorder %s3551_s25, %s3264_s6  ;;  %s3269_s21 = scalar_lea.hbm %s3979_s2, 128 }
  0x54   : > { %p3999_p4 = pneg %p3998_p0  ;;  %p3270_p9 = scmp.lt.u32.totalorder %s3551_s25, %s3979_s2 }
  0x55   : > { %p3271_p12 = scmp.lt.u32.totalorder %s3269_s21, %s3264_s6  ;;  %p3273_p2 = scmp.lt.u32.totalorder %s3264_s6, %s3551_s25 }
  0x56   : > { %p3267_p7 = pnand %p3265_p8, %p3999_p4 }
  0x57   : > { %p3272_p10 = por %p3271_p12, %p3270_p9 }
  0x58   : > { %p3268_p6 = pneg %p3267_p7 }
  0x59   : > { %p3274_p3 = por %p3273_p2, %p3272_p10 }
  0x5b   : > { %p3275_p5 = pnand %p3274_p3, %p3268_p6 }
  0x5d   : > { %3278 = shalt.err (!%p3275_p5)
}
  0x5e   : > { %s3279_s10 = scalar_lea.vmem %s3553_s27, 32  ;;  %p4000_p11 = pmov %p3999_p4 }
  0x5f   : > { %p3280_p1 = scmp.ne.s32.totalorder %s3553_s27, %s3279_s10  ;;  %s3389_s20 = smov [#allocation7]  }
  0x60   : > { %s3284_s1 = sshll.u32 %s3389_s20, 4  ;;  %s3285_s1 = int_to_ptr.vmem [resolvable:$false] %s3284_s1 }
  0x61   : > { %p3282_p13 = pnand %p3280_p1, %p4000_p11  ;;  %s3286_s18 = scalar_lea.vmem %s3285_s1, 64 }
  0x62   : > { %p3287_p4 = scmp.lt.s32.totalorder %s3553_s27, %s3285_s1  ;;  %p3288_p7 = scmp.lt.s32.totalorder %s3286_s18, %s3279_s10 }
  0x63   : > { %p3283_p8 = pneg %p3282_p13 }
  0x64   : > { %p3289_p9 = por %p3288_p7, %p3287_p4 }
  0x66   : > { %p3290_p12 = pnand %p3289_p9, %p3283_p8 }
  0x68   : > { %3293 = shalt.err (!%p3290_p12)
}
  0x69   : > { %2756 = dma.hbm_to_vmem [thread:$0]  (!%p3998_p0), %s3551_s25, 32, %s3553_s27, %s3476_s5  }
  0x6a   : > { %p4001_p6 = scmp.ne.s32.totalorder %s3996_s8, 0 }
  0x6b   : > { %p4002_p10 = scmp.eq.s32.totalorder (!%p4001_p6), %s3505_s30, 0 }
  0x6c   : > { %215 = sbr.rel (%p4001_p6) target bundleno = 615 (0x267), region = 32 }
  0x73   : > { %3347 = dma.done.wait (%p4002_p10), [#allocation3], 2048   ;;  %p4003_p2 = pmov %p4002_p10 }
  0x74   : > { %s221_s19 = sand.u32 1, %s3505_s30   ;;  %s3608_s26 = sand.u32 1, %s3364_s13  }
  0x75   : > { %3349 = vsyncadd (%p4003_p2), [#allocation3], 4294965248  ;;  %s2417_s29 = sshll.u32 %s3608_s26, 11  ;;  %s222_s6 = scalar_lea.sflag [#allocation6], %s221_s19 }
  0x76   : > { %s3611_s9 = scalar_lea.vmem [#allocation5], %s2417_s29  ;;  %p4004_p0 = scmp.ne.s32.totalorder %s3993_s7, 0 }
  0x78   : > { %3351 = dma.done.wait (%p4004_p0), %s222_s6, 32800  }
  0x79   : > { %3353 = vsyncadd (%p4004_p0), %s222_s6, 4294934496  ;;  %v2822_v0 = vld [vmem:[%s3611_s9 + $0x4] ss:$8 sps:$4 sm:$0xff]   ;;  %v2826_v2 = vld [vmem:[%s3611_s9] ss:$8 sps:$4 sm:$0xff]   ;;  %s2418_s5 = sshll.u32 %s3608_s26, 1 }
  0x7a   : > { %v2824_v1 = vld [vmem:[%s3611_s9 + $0x404] ss:$8 sps:$4 sm:$0xff]   ;;  %1911 = vmatprep.subr.bf16.mxu1 %v2822_v0  ;;  %v2827_v3 = vld [vmem:[%s3611_s9 + $0x400] ss:$8 sps:$4 sm:$0xff]   ;;  %v2828_v4 = vld [vmem:[%s3611_s9 + $0x14] ss:$8 sps:$4 sm:$0xff]  }
  0x7b   : > { %2083 = vmatprep.subr.bf16.mxu0 %v2824_v1  ;;  %1912 = vmatpush1.bf16.msra.mxu1 %v2826_v2  ;;  %v2830_v5 = vld [vmem:[%s3611_s9 + $0x414] ss:$8 sps:$4 sm:$0xff]   ;;  %v2832_v6 = vld [vmem:[%s3611_s9 + $0x10] ss:$8 sps:$4 sm:$0xff]   ;;  %v2834_v8 = vld [vmem:[%s3611_s9 + $0x24] ss:$8 sps:$4 sm:$0xff]  }
  0x7c   : > { %2084 = vmatpush1.bf16.msra.mxu0 %v2827_v3  ;;  %1913 = vmatprep.subr.bf16.mxu1 %v2828_v4  ;;  %v2833_v7 = vld [vmem:[%s3611_s9 + $0x410] ss:$8 sps:$4 sm:$0xff]   ;;  %v2836_v9 = vld [vmem:[%s3611_s9 + $0x424] ss:$8 sps:$4 sm:$0xff]   ;;  %v2838_v10 = vld [vmem:[%s3611_s9 + $0x20] ss:$8 sps:$4 sm:$0xff]  }
  0x7d   : > { %2085 = vmatprep.subr.bf16.mxu0 %v2830_v5  ;;  %v2839_v11 = vld [vmem:[%s3611_s9 + $0x420] ss:$8 sps:$4 sm:$0xff]   ;;  %v2840_v12 = vld [vmem:[%s3611_s9 + $0x34] ss:$8 sps:$4 sm:$0xff]   ;;  %v2844_v14 = vld [vmem:[%s3611_s9 + $0x30] ss:$8 sps:$4 sm:$0xff]  }
  0x7e   : > { %v2842_v13 = vld [vmem:[%s3611_s9 + $0x434] ss:$8 sps:$4 sm:$0xff]   ;;  %v2845_v15 = vld [vmem:[%s3611_s9 + $0x430] ss:$8 sps:$4 sm:$0xff]   ;;  %v2846_v16 = vld [vmem:[%s3611_s9 + $0x44] ss:$8 sps:$4 sm:$0xff]  }
  0x7f   : > { %1914 = vmatpush1.bf16.msra.mxu1 %v2832_v6  ;;  %v2848_v17 = vld [vmem:[%s3611_s9 + $0x444] ss:$8 sps:$4 sm:$0xff]   ;;  %v2850_v18 = vld [vmem:[%s3611_s9 + $0x40] ss:$8 sps:$4 sm:$0xff]   ;;  %v2852_v20 = vld [vmem:[%s3611_s9 + $0x54] ss:$8 sps:$4 sm:$0xff]  }
  0x80   : > { %2086 = vmatpush1.bf16.msra.mxu0 %v2833_v7  ;;  %1915 = vmatprep.subr.bf16.mxu1 %v2834_v8  ;;  %v2851_v19 = vld [vmem:[%s3611_s9 + $0x440] ss:$8 sps:$4 sm:$0xff]   ;;  %v2854_v21 = vld [vmem:[%s3611_s9 + $0x454] ss:$8 sps:$4 sm:$0xff]   ;;  %v2856_v22 = vld [vmem:[%s3611_s9 + $0x50] ss:$8 sps:$4 sm:$0xff]  }
  0x81   : > { %2087 = vmatprep.subr.bf16.mxu0 %v2836_v9  ;;  %v2857_v23 = vld [vmem:[%s3611_s9 + $0x450] ss:$8 sps:$4 sm:$0xff]   ;;  %v2858_v24 = vld [vmem:[%s3611_s9 + $0x64] ss:$8 sps:$4 sm:$0xff]   ;;  %v2862_v26 = vld [vmem:[%s3611_s9 + $0x60] ss:$8 sps:$4 sm:$0xff]  }
  0x82   : > { %v2860_v25 = vld [vmem:[%s3611_s9 + $0x464] ss:$8 sps:$4 sm:$0xff]   ;;  %v2863_v27 = vld [vmem:[%s3611_s9 + $0x460] ss:$8 sps:$4 sm:$0xff]   ;;  %v2864_v28 = vld [vmem:[%s3611_s9 + $0x74] ss:$8 sps:$4 sm:$0xff]  }
  0x83   : > { %1916 = vmatpush1.bf16.msra.mxu1 %v2838_v10  ;;  %v2866_v29 = vld [vmem:[%s3611_s9 + $0x474] ss:$8 sps:$4 sm:$0xff]   ;;  %v2868_v30 = vld [vmem:[%s3611_s9 + $0x70] ss:$8 sps:$4 sm:$0xff]   ;;  %v2870_v32 = vld [vmem:[%s3611_s9 + $0x84] ss:$8 sps:$4 sm:$0xff]  }
  0x84   : > { %2088 = vmatpush1.bf16.msra.mxu0 %v2839_v11  ;;  %1917 = vmatprep.subr.bf16.mxu1 %v2840_v12  ;;  %v2869_v31 = vld [vmem:[%s3611_s9 + $0x470] ss:$8 sps:$4 sm:$0xff]   ;;  %v2872_v33 = vld [vmem:[%s3611_s9 + $0x484] ss:$8 sps:$4 sm:$0xff]   ;;  %v2874_v34 = vld [vmem:[%s3611_s9 + $0x80] ss:$8 sps:$4 sm:$0xff]  }
  0x85   : > { %2089 = vmatprep.subr.bf16.mxu0 %v2842_v13  ;;  %v2875_v35 = vld [vmem:[%s3611_s9 + $0x480] ss:$8 sps:$4 sm:$0xff]   ;;  %v2876_v36 = vld [vmem:[%s3611_s9 + $0x94] ss:$8 sps:$4 sm:$0xff]   ;;  %v2880_v38 = vld [vmem:[%s3611_s9 + $0x90] ss:$8 sps:$4 sm:$0xff]  }
  0x86   : > { %v2878_v37 = vld [vmem:[%s3611_s9 + $0x494] ss:$8 sps:$4 sm:$0xff]   ;;  %v2881_v39 = vld [vmem:[%s3611_s9 + $0x490] ss:$8 sps:$4 sm:$0xff]   ;;  %v2882_v40 = vld [vmem:[%s3611_s9 + $0xa4] ss:$8 sps:$4 sm:$0xff]  }
  0x87   : > { %1918 = vmatpush1.bf16.msra.mxu1 %v2844_v14  ;;  %v2884_v41 = vld [vmem:[%s3611_s9 + $0x4a4] ss:$8 sps:$4 sm:$0xff]   ;;  %v2886_v42 = vld [vmem:[%s3611_s9 + $0xa0] ss:$8 sps:$4 sm:$0xff]   ;;  %v2888_v44 = vld [vmem:[%s3611_s9 + $0xb4] ss:$8 sps:$4 sm:$0xff]  }
  0x88   : > { %2090 = vmatpush1.bf16.msra.mxu0 %v2845_v15  ;;  %1919 = vmatprep.subr.bf16.mxu1 %v2846_v16  ;;  %v2887_v43 = vld [vmem:[%s3611_s9 + $0x4a0] ss:$8 sps:$4 sm:$0xff]   ;;  %v2890_v45 = vld [vmem:[%s3611_s9 + $0x4b4] ss:$8 sps:$4 sm:$0xff]   ;;  %v2892_v46 = vld [vmem:[%s3611_s9 + $0xb0] ss:$8 sps:$4 sm:$0xff]  }
  0x89   : > { %2091 = vmatprep.subr.bf16.mxu0 %v2848_v17  ;;  %v2893_v47 = vld [vmem:[%s3611_s9 + $0x4b0] ss:$8 sps:$4 sm:$0xff]   ;;  %v267_v48 = vld [vmem:[#allocation2] sm:$0xff]  ;;  %v2900_v58 = vld [vmem:[%s3611_s9 + $0xd4] ss:$8 sps:$4 sm:$0xff]   ;;  %s234_s30 = scalar_lea.vmem [#allocation7], %s2418_s5 }
  0x8a   : > { %v275_v49 = vld [vmem:[#allocation2 + $0x40] sm:$0xff]  ;;  %v2902_v59 = vld [vmem:[%s3611_s9 + $0x4d4] ss:$8 sps:$4 sm:$0xff]   ;;  %v2904_v60 = vld [vmem:[%s3611_s9 + $0xd0] ss:$8 sps:$4 sm:$0xff]   ;;  %s2419_s7 = sshll.u32 %s3608_s26, 4 }
  0x8b   : > { %1920 = vmatpush1.bf16.msra.mxu1 %v2850_v18  ;;  %v2894_v50 = vld [vmem:[%s3611_s9 + $0xc4] ss:$8 sps:$4 sm:$0xff]   ;;  %v2421_v52 = vcombine.high %v267_v48, %v275_v49  ;;  %v2898_v56 = vld [vmem:[%s3611_s9 + $0xc0] ss:$8 sps:$4 sm:$0xff]   ;;  %v2905_v61 = vld [vmem:[%s3611_s9 + $0x4d0] ss:$8 sps:$4 sm:$0xff]   ;;  %v2420_v8 = vcombine.low %v267_v48, %v275_v49 }
  0x8c   : > { %2092 = vmatpush1.bf16.msra.mxu0 %v2851_v19  ;;  %1921 = vmatprep.subr.bf16.mxu1 %v2852_v20  ;;  %v2896_v51 = vld [vmem:[%s3611_s9 + $0x4c4] ss:$8 sps:$4 sm:$0xff]   ;;  %v2899_v57 = vld [vmem:[%s3611_s9 + $0x4c0] ss:$8 sps:$4 sm:$0xff]   ;;  %v2912_v2 = vld [vmem:[%s3611_s9 + $0xf4] ss:$8 sps:$4 sm:$0xff]  }
  0x8d   : > { %2093 = vmatprep.subr.bf16.mxu0 %v2854_v21  ;;  %v271_v53 = vld [vmem:[#allocation2 + $0x20] sm:$0xff]  ;;  %1943 = vmatprep.mubr.bf16.mxu1 %v2421_v52  ;;  %v2914_v3 = vld [vmem:[%s3611_s9 + $0x4f4] ss:$8 sps:$4 sm:$0xff]   ;;  %v2916_v4 = vld [vmem:[%s3611_s9 + $0xf0] ss:$8 sps:$4 sm:$0xff]   ;;  %s261_s8 = scalar_lea.vmem [#allocation8], %s2419_s7 }
  0x8e   : > { %v279_v54 = vld [vmem:[#allocation2 + $0x60] sm:$0xff]  ;;  %v2917_v5 = vld [vmem:[%s3611_s9 + $0x4f0] ss:$8 sps:$4 sm:$0xff]   ;;  %v2926_v12 = vld [vmem:[%s3611_s9 + $0x114] ss:$8 sps:$4 sm:$0xff]   ;;  %s2286_s25 = sshll.u32 %s261_s8, 4  ;;  %s3924_s25 = int_to_ptr.vmem [resolvable:$true] %s2286_s25 }
  0x8f   : > { %1922 = vmatpush1.bf16.msra.mxu1 %v2856_v22  ;;  %v2429_v55 = vcombine.high %v271_v53, %v279_v54  ;;  %v2906_v62 = vld [vmem:[%s3611_s9 + $0xe4] ss:$8 sps:$4 sm:$0xff]   ;;  %v2910_v0 = vld [vmem:[%s3611_s9 + $0xe0] ss:$8 sps:$4 sm:$0xff]   ;;  %v2428_v10 = vcombine.low %v271_v53, %v279_v54  ;;  %v2929_v13 = vld [vmem:[%s3611_s9 + $0x514] ss:$8 sps:$4 sm:$0xff]  }
  0x90   : > { %2094 = vmatpush1.bf16.msra.mxu0 %v2857_v23  ;;  %1923 = vmatprep.subr.bf16.mxu1 %v2858_v24  ;;  %v2908_v63 = vld [vmem:[%s3611_s9 + $0x4e4] ss:$8 sps:$4 sm:$0xff]   ;;  %v2911_v1 = vld [vmem:[%s3611_s9 + $0x4e0] ss:$8 sps:$4 sm:$0xff]   ;;  %v2924_v14 = vld [vmem:[%s3611_s9 + $0x110] ss:$8 sps:$4 sm:$0xff]  }
  0x91   : > { %2095 = vmatprep.subr.bf16.mxu0 %v2860_v25  ;;  %2115 = vmatprep.mubr.bf16.mxu0 %v2429_v55  ;;  %v2920_v6 = vld [vmem:[%s3611_s9 + $0x104] ss:$8 sps:$4 sm:$0xff]   ;;  %v2918_v9 = vld [vmem:[%s3611_s9 + $0x100] ss:$8 sps:$4 sm:$0xff]   ;;  %v2927_v15 = vld [vmem:[%s3611_s9 + $0x510] ss:$8 sps:$4 sm:$0xff]  }
  0x92   : > { %v2923_v7 = vld [vmem:[%s3611_s9 + $0x504] ss:$8 sps:$4 sm:$0xff]   ;;  %v2921_v11 = vld [vmem:[%s3611_s9 + $0x500] ss:$8 sps:$4 sm:$0xff]   ;;  %v2938_v20 = vld [vmem:[%s3611_s9 + $0x134] ss:$8 sps:$4 sm:$0xff]  }
  0x93   : > { %1924 = vmatpush1.bf16.msra.mxu1 %v2862_v26  ;;  %v2932_v16 = vld [vmem:[%s3611_s9 + $0x124] ss:$8 sps:$4 sm:$0xff]   ;;  %v2930_v18 = vld [vmem:[%s3611_s9 + $0x120] ss:$8 sps:$4 sm:$0xff]   ;;  %v2941_v21 = vld [vmem:[%s3611_s9 + $0x534] ss:$8 sps:$4 sm:$0xff]  }
  0x94   : > { %2096 = vmatpush1.bf16.msra.mxu0 %v2863_v27  ;;  %1925 = vmatprep.subr.bf16.mxu1 %v2864_v28  ;;  %v2935_v17 = vld [vmem:[%s3611_s9 + $0x524] ss:$8 sps:$4 sm:$0xff]   ;;  %v2933_v19 = vld [vmem:[%s3611_s9 + $0x520] ss:$8 sps:$4 sm:$0xff]   ;;  %v2936_v22 = vld [vmem:[%s3611_s9 + $0x130] ss:$8 sps:$4 sm:$0xff]  }
  0x95   : > { %2097 = vmatprep.subr.bf16.mxu0 %v2866_v29  ;;  %v2939_v23 = vld [vmem:[%s3611_s9 + $0x530] ss:$8 sps:$4 sm:$0xff]   ;;  %v2944_v24 = vld [vmem:[%s3611_s9 + $0x144] ss:$8 sps:$4 sm:$0xff]   ;;  %v2942_v26 = vld [vmem:[%s3611_s9 + $0x140] ss:$8 sps:$4 sm:$0xff]  }
  0x96   : > { %v2947_v25 = vld [vmem:[%s3611_s9 + $0x544] ss:$8 sps:$4 sm:$0xff]   ;;  %v2945_v27 = vld [vmem:[%s3611_s9 + $0x540] ss:$8 sps:$4 sm:$0xff]   ;;  %v2950_v28 = vld [vmem:[%s3611_s9 + $0x154] ss:$8 sps:$4 sm:$0xff]  }
  0x97   : > { %1926 = vmatpush1.bf16.msra.mxu1 %v2868_v30  ;;  %v2953_v29 = vld [vmem:[%s3611_s9 + $0x554] ss:$8 sps:$4 sm:$0xff]   ;;  %v2948_v30 = vld [vmem:[%s3611_s9 + $0x150] ss:$8 sps:$4 sm:$0xff]   ;;  %v2966_v48 = vld [vmem:[%s3611_s9 + $0x180] ss:$8 sps:$4 sm:$0xff]  }
  0x98   : > { %2098 = vmatpush1.bf16.msra.mxu0 %v2869_v31  ;;  %1927 = vmatprep.subr.bf16.mxu1 %v2870_v32  ;;  %v2951_v31 = vld [vmem:[%s3611_s9 + $0x550] ss:$8 sps:$4 sm:$0xff]   ;;  %v2956_v32 = vld [vmem:[%s3611_s9 + $0x164] ss:$8 sps:$4 sm:$0xff]   ;;  %v2969_v49 = vld [vmem:[%s3611_s9 + $0x580] ss:$8 sps:$4 sm:$0xff]  }
  0x99   : > { %2099 = vmatprep.subr.bf16.mxu0 %v2872_v33  ;;  %v2959_v33 = vld [vmem:[%s3611_s9 + $0x564] ss:$8 sps:$4 sm:$0xff]   ;;  %v2972_v52 = vld [vmem:[%s3611_s9 + $0x190] ss:$8 sps:$4 sm:$0xff]   ;;  %s2703_s27 = sshll.u32 %s3372_s15, 7  ;;  %s2270_s11 = scalar_lea.sflag [#allocation4], %s3608_s26 }
  0x9a   : > { %v2975_v53 = vld [vmem:[%s3611_s9 + $0x590] ss:$8 sps:$4 sm:$0xff]   ;;  %v2980_v54 = vld [vmem:[%s3611_s9 + $0x1a4] ss:$8 sps:$4 sm:$0xff]   ;;  %s3929_s23 = scalar_lea.hbm %s3980_s3, %s2703_s27  ;;  %s3294_s10 = scalar_lea.vmem %s3924_s25, 256 }
  0x9b   : > { %1928 = vmatpush1.bf16.msra.mxu1 %v2874_v34  ;;  %v2954_v34 = vld [vmem:[%s3611_s9 + $0x160] ss:$8 sps:$4 sm:$0xff]   ;;  %v2983_v55 = vld [vmem:[%s3611_s9 + $0x5a4] ss:$8 sps:$4 sm:$0xff]   ;;  %p3295_p3 = scmp.ne.s32.totalorder %s3924_s25, %s3294_s10  ;;  %p4005_p5 = scmp.ne.s32.totalorder %s3994_s28, 0 }
  0x9c   : > { %2100 = vmatpush1.bf16.msra.mxu0 %v2875_v35  ;;  %1929 = vmatprep.subr.bf16.mxu1 %v2876_v36  ;;  %v2957_v35 = vld [vmem:[%s3611_s9 + $0x560] ss:$8 sps:$4 sm:$0xff]   ;;  %s3390_s15 = smov [#allocation8]  }
  0x9d   : > { %2101 = vmatprep.subr.bf16.mxu0 %v2878_v37  ;;  %v3709_v36 = vld [vmem:[#allocation2 + $0x8] sm:$0xff]  ;;  %p3296_p1 = pnand %p3295_p3, %p4005_p5  ;;  %s3298_s20 = sshll.u32 %s3390_s15, 4  ;;  %s3299_s20 = int_to_ptr.vmem [resolvable:$false] %s3298_s20 }
  0x9e   : > { %v3711_v37 = vld [vmem:[#allocation2 + $0x48] sm:$0xff]  ;;  %s3300_s1 = scalar_lea.vmem %s3299_s20, 512  ;;  %p3301_p13 = scmp.lt.s32.totalorder %s3924_s25, %s3299_s20 }
  0x9f   : > { %1930 = vmatpush1.bf16.msra.mxu1 %v2880_v38  ;;  %v2962_v38 = vld [vmem:[%s3611_s9 + $0x174] ss:$8 sps:$4 sm:$0xff]   ;;  %p3297_p11 = pneg %p3296_p1  ;;  %p3302_p8 = scmp.lt.s32.totalorder %s3300_s1, %s3294_s10 }
  0xa0   : > { %2102 = vmatpush1.bf16.msra.mxu0 %v2881_v39  ;;  %1931 = vmatprep.subr.bf16.mxu1 %v2882_v40  ;;  %v2965_v39 = vld [vmem:[%s3611_s9 + $0x574] ss:$8 sps:$4 sm:$0xff]   ;;  %v2423_v40 = vcombine.high %v3709_v36, %v3711_v37 }
  0xa1   : > { %2103 = vmatprep.subr.bf16.mxu0 %v2884_v41  ;;  %v3717_v41 = vld [vmem:[#allocation2 + $0x28] sm:$0xff]  ;;  %p3303_p4 = por %p3302_p8, %p3301_p13 }
  0xa3   : > { %1932 = vmatpush1.bf16.msra.mxu1 %v2886_v42  ;;  %v3719_v42 = vld [vmem:[#allocation2 + $0x68] sm:$0xff]  ;;  %p3304_p7 = pnand %p3303_p4, %p3297_p11 }
  0xa4   : > { %2104 = vmatpush1.bf16.msra.mxu0 %v2887_v43  ;;  %1933 = vmatprep.subr.bf16.mxu1 %v2888_v44  ;;  %v2431_v43 = vcombine.high %v3717_v41, %v3719_v42  ;;  %v2960_v44 = vld [vmem:[%s3611_s9 + $0x170] ss:$8 sps:$4 sm:$0xff]  }
  0xa5   : > { %2105 = vmatprep.subr.bf16.mxu0 %v2890_v45  ;;  %v2963_v45 = vld [vmem:[%s3611_s9 + $0x570] ss:$8 sps:$4 sm:$0xff]  }
  0xa7   : > { %1934 = vmatpush1.bf16.msra.mxu1 %v2892_v46  ;;  %v2968_v46 = vld [vmem:[%s3611_s9 + $0x184] ss:$8 sps:$4 sm:$0xff]  }
  0xa8   : > { %2106 = vmatpush1.bf16.msra.mxu0 %v2893_v47  ;;  %1935 = vmatprep.subr.bf16.mxu1 %v2894_v50  ;;  %v2971_v47 = vld [vmem:[%s3611_s9 + $0x584] ss:$8 sps:$4 sm:$0xff]   ;;  %v2974_v50 = vld [vmem:[%s3611_s9 + $0x194] ss:$8 sps:$4 sm:$0xff]  }
  0xa9   : > { %2107 = vmatprep.subr.bf16.mxu0 %v2896_v51  ;;  %v2977_v51 = vld [vmem:[%s3611_s9 + $0x594] ss:$8 sps:$4 sm:$0xff]  }
  0xab   : > { %1936 = vmatpush1.bf16.msra.mxu1 %v2898_v56  ;;  %v2978_v56 = vld [vmem:[%s3611_s9 + $0x1a0] ss:$8 sps:$4 sm:$0xff]  }
  0xac   : > { %2108 = vmatpush1.bf16.msra.mxu0 %v2899_v57  ;;  %1937 = vmatprep.subr.bf16.mxu1 %v2900_v58  ;;  %v2981_v57 = vld [vmem:[%s3611_s9 + $0x5a0] ss:$8 sps:$4 sm:$0xff]   ;;  %v2986_v58 = vld [vmem:[%s3611_s9 + $0x1b4] ss:$8 sps:$4 sm:$0xff]  }
  0xad   : > { %2109 = vmatprep.subr.bf16.mxu0 %v2902_v59  ;;  %v2989_v59 = vld [vmem:[%s3611_s9 + $0x5b4] ss:$8 sps:$4 sm:$0xff]  }
  0xaf   : > { %1938 = vmatpush1.bf16.msra.mxu1 %v2904_v60  ;;  %v2984_v60 = vld [vmem:[%s3611_s9 + $0x1b0] ss:$8 sps:$4 sm:$0xff]  }
  0xb0   : > { %2110 = vmatpush1.bf16.msra.mxu0 %v2905_v61  ;;  %1939 = vmatprep.subr.bf16.mxu1 %v2906_v62  ;;  %v2987_v61 = vld [vmem:[%s3611_s9 + $0x5b0] ss:$8 sps:$4 sm:$0xff]   ;;  %v2992_v62 = vld [vmem:[%s3611_s9 + $0x1c4] ss:$8 sps:$4 sm:$0xff]  }
  0xb1   : > { %2111 = vmatprep.subr.bf16.mxu0 %v2908_v63  ;;  %v2995_v63 = vld [vmem:[%s3611_s9 + $0x5c4] ss:$8 sps:$4 sm:$0xff]  }
  0xb3   : > { %1940 = vmatpush1.bf16.msra.mxu1 %v2910_v0  ;;  %v2990_v0 = vld [vmem:[%s3611_s9 + $0x1c0] ss:$8 sps:$4 sm:$0xff]  }
  0xb4   : > { %2112 = vmatpush1.bf16.msra.mxu0 %v2911_v1  ;;  %1941 = vmatprep.subr.bf16.mxu1 %v2912_v2  ;;  %v2993_v1 = vld [vmem:[%s3611_s9 + $0x5c0] ss:$8 sps:$4 sm:$0xff]   ;;  %v2998_v2 = vld [vmem:[%s3611_s9 + $0x1d4] ss:$8 sps:$4 sm:$0xff]  }
  0xb5   : > { %2113 = vmatprep.subr.bf16.mxu0 %v2914_v3  ;;  %v3001_v3 = vld [vmem:[%s3611_s9 + $0x5d4] ss:$8 sps:$4 sm:$0xff]  }
  0xb7   : > { %1942 = vmatpush1.bf16.msra.mxu1 %v2916_v4  ;;  %v2996_v4 = vld [vmem:[%s3611_s9 + $0x1d0] ss:$8 sps:$4 sm:$0xff]  }
  0xb8   : > { %2114 = vmatpush1.bf16.msra.mxu0 %v2917_v5  ;;  %1954 = vmatprep.subr.bf16.mxu1 %v2920_v6  ;;  %v2999_v5 = vld [vmem:[%s3611_s9 + $0x5d0] ss:$8 sps:$4 sm:$0xff]   ;;  %v3004_v6 = vld [vmem:[%s3611_s9 + $0x1e4] ss:$8 sps:$4 sm:$0xff]  }
  0xb9   : > { %2126 = vmatprep.subr.bf16.mxu0 %v2923_v7  ;;  %v3007_v7 = vld [vmem:[%s3611_s9 + $0x5e4] ss:$8 sps:$4 sm:$0xff]  }
  0xba   : > { %1944 = vmatmul.mubr.bf16.vlgmr.msra.gmra.mrb[0].mxu1 %v2420_v8  ;;  %v3002_v8 = vld [vmem:[%s3611_s9 + $0x1e0] ss:$8 sps:$4 sm:$0xff]  }
  0xbb   : > { %2116 = vmatmul.mubr.bf16.vlgmr.msra.gmra.mrb[0].mxu0 %v2428_v10  ;;  %1955 = vmatpush1.bf16.msra.mxu1 %v2918_v9  ;;  %v3005_v9 = vld [vmem:[%s3611_s9 + $0x5e0] ss:$8 sps:$4 sm:$0xff]   ;;  %v3010_v10 = vld [vmem:[%s3611_s9 + $0x1f4] ss:$8 sps:$4 sm:$0xff]  }
  0xbc   : > { %2127 = vmatpush1.bf16.msra.mxu0 %v2921_v11  ;;  %1956 = vmatprep.subr.bf16.mxu1 %v2926_v12  ;;  %v3013_v11 = vld [vmem:[%s3611_s9 + $0x5f4] ss:$8 sps:$4 sm:$0xff]   ;;  %v3008_v12 = vld [vmem:[%s3611_s9 + $0x1f0] ss:$8 sps:$4 sm:$0xff]  }
  0xbd   : > { %2128 = vmatprep.subr.bf16.mxu0 %v2929_v13  ;;  %1986 = vmatprep.mubr.bf16.mxu1 %v2423_v40  ;;  %v3011_v13 = vld [vmem:[%s3611_s9 + $0x5f0] ss:$8 sps:$4 sm:$0xff]   ;;  %v3038_v40 = vld [vmem:[%s3611_s9 + $0x240] ss:$8 sps:$4 sm:$0xff]  }
  0xbe   : > { %2158 = vmatprep.mubr.bf16.mxu0 %v2431_v43  ;;  %v3049_v43 = vld [vmem:[%s3611_s9 + $0x654] ss:$8 sps:$4 sm:$0xff]  }
  0xbf   : > { %1957 = vmatpush1.bf16.msra.mxu1 %v2924_v14  ;;  %v3016_v14 = vld [vmem:[%s3611_s9 + $0x204] ss:$8 sps:$4 sm:$0xff]  }
  0xc0   : > { %2129 = vmatpush1.bf16.msra.mxu0 %v2927_v15  ;;  %1958 = vmatprep.subr.bf16.mxu1 %v2932_v16  ;;  %v3019_v15 = vld [vmem:[%s3611_s9 + $0x604] ss:$8 sps:$4 sm:$0xff]   ;;  %v2422_v16 = vcombine.low %v3709_v36, %v3711_v37  ;;  %v3032_v36 = vld [vmem:[%s3611_s9 + $0x230] ss:$8 sps:$4 sm:$0xff]  }
  0xc1   : > { %2130 = vmatprep.subr.bf16.mxu0 %v2935_v17  ;;  %v3014_v17 = vld [vmem:[%s3611_s9 + $0x200] ss:$8 sps:$4 sm:$0xff]   ;;  %v3035_v37 = vld [vmem:[%s3611_s9 + $0x630] ss:$8 sps:$4 sm:$0xff]  }
  0xc3   : > { %1959 = vmatpush1.bf16.msra.mxu1 %v2930_v18  ;;  %v2430_v18 = vcombine.low %v3717_v41, %v3719_v42  ;;  %v3041_v41 = vld [vmem:[%s3611_s9 + $0x640] ss:$8 sps:$4 sm:$0xff]   ;;  %v3046_v42 = vld [vmem:[%s3611_s9 + $0x254] ss:$8 sps:$4 sm:$0xff]  }
  0xc4   : > { %2131 = vmatpush1.bf16.msra.mxu0 %v2933_v19  ;;  %1960 = vmatprep.subr.bf16.mxu1 %v2938_v20  ;;  %v3017_v19 = vld [vmem:[%s3611_s9 + $0x600] ss:$8 sps:$4 sm:$0xff]   ;;  %v3022_v20 = vld [vmem:[%s3611_s9 + $0x214] ss:$8 sps:$4 sm:$0xff]  }
  0xc5   : > { %2132 = vmatprep.subr.bf16.mxu0 %v2941_v21  ;;  %v3025_v21 = vld [vmem:[%s3611_s9 + $0x614] ss:$8 sps:$4 sm:$0xff]  }
  0xc7   : > { %1961 = vmatpush1.bf16.msra.mxu1 %v2936_v22  ;;  %v3020_v22 = vld [vmem:[%s3611_s9 + $0x210] ss:$8 sps:$4 sm:$0xff]  }
  0xc8   : > { %2133 = vmatpush1.bf16.msra.mxu0 %v2939_v23  ;;  %1962 = vmatprep.subr.bf16.mxu1 %v2944_v24  ;;  %v3023_v23 = vld [vmem:[%s3611_s9 + $0x610] ss:$8 sps:$4 sm:$0xff]  }
  0xc9   : > { %2134 = vmatprep.subr.bf16.mxu0 %v2947_v25  ;;  %v3769_v24 = vld [vmem:[#allocation2 + $0x10] sm:$0xff] }
  0xca   : > { %v3771_v25 = vld [vmem:[#allocation2 + $0x50] sm:$0xff] }
  0xcb   : > { %1963 = vmatpush1.bf16.msra.mxu1 %v2942_v26  ;;  %v3028_v26 = vld [vmem:[%s3611_s9 + $0x224] ss:$8 sps:$4 sm:$0xff]  }
  0xcc   : > { %2135 = vmatpush1.bf16.msra.mxu0 %v2945_v27  ;;  %1964 = vmatprep.subr.bf16.mxu1 %v2950_v28  ;;  %v3031_v27 = vld [vmem:[%s3611_s9 + $0x624] ss:$8 sps:$4 sm:$0xff]   ;;  %v2425_v28 = vcombine.high %v3769_v24, %v3771_v25 }
  0xcd   : > { %2136 = vmatprep.subr.bf16.mxu0 %v2953_v29  ;;  %v3777_v29 = vld [vmem:[#allocation2 + $0x30] sm:$0xff] }
  0xcf   : > { %1965 = vmatpush1.bf16.msra.mxu1 %v2948_v30  ;;  %v3779_v30 = vld [vmem:[#allocation2 + $0x70] sm:$0xff] }
  0xd0   : > { %2137 = vmatpush1.bf16.msra.mxu0 %v2951_v31  ;;  %1966 = vmatprep.subr.bf16.mxu1 %v2956_v32  ;;  %v2433_v31 = vcombine.high %v3777_v29, %v3779_v30  ;;  %v3026_v32 = vld [vmem:[%s3611_s9 + $0x220] ss:$8 sps:$4 sm:$0xff]  }
  0xd1   : > { %2138 = vmatprep.subr.bf16.mxu0 %v2959_v33  ;;  %v3029_v33 = vld [vmem:[%s3611_s9 + $0x620] ss:$8 sps:$4 sm:$0xff]  }
  0xd3   : > { %1967 = vmatpush1.bf16.msra.mxu1 %v2954_v34  ;;  %v3034_v34 = vld [vmem:[%s3611_s9 + $0x234] ss:$8 sps:$4 sm:$0xff]  }
  0xd4   : > { %2139 = vmatpush1.bf16.msra.mxu0 %v2957_v35  ;;  %1968 = vmatprep.subr.bf16.mxu1 %v2962_v38  ;;  %v3037_v35 = vld [vmem:[%s3611_s9 + $0x634] ss:$8 sps:$4 sm:$0xff]   ;;  %v3040_v38 = vld [vmem:[%s3611_s9 + $0x244] ss:$8 sps:$4 sm:$0xff]  }
  0xd5   : > { %2140 = vmatprep.subr.bf16.mxu0 %v2965_v39  ;;  %v3043_v39 = vld [vmem:[%s3611_s9 + $0x644] ss:$8 sps:$4 sm:$0xff]  }
  0xd7   : > { %1969 = vmatpush1.bf16.msra.mxu1 %v2960_v44  ;;  %v3044_v44 = vld [vmem:[%s3611_s9 + $0x250] ss:$8 sps:$4 sm:$0xff]  }
  0xd8   : > { %2141 = vmatpush1.bf16.msra.mxu0 %v2963_v45  ;;  %1970 = vmatprep.subr.bf16.mxu1 %v2968_v46  ;;  %v3047_v45 = vld [vmem:[%s3611_s9 + $0x650] ss:$8 sps:$4 sm:$0xff]   ;;  %v3052_v46 = vld [vmem:[%s3611_s9 + $0x264] ss:$8 sps:$4 sm:$0xff]  }
  0xd9   : > { %2142 = vmatprep.subr.bf16.mxu0 %v2971_v47  ;;  %v3055_v47 = vld [vmem:[%s3611_s9 + $0x664] ss:$8 sps:$4 sm:$0xff]  }
  0xdb   : > { %1971 = vmatpush1.bf16.msra.mxu1 %v2966_v48  ;;  %v3050_v48 = vld [vmem:[%s3611_s9 + $0x260] ss:$8 sps:$4 sm:$0xff]  }
  0xdc   : > { %2143 = vmatpush1.bf16.msra.mxu0 %v2969_v49  ;;  %1972 = vmatprep.subr.bf16.mxu1 %v2974_v50  ;;  %v3053_v49 = vld [vmem:[%s3611_s9 + $0x660] ss:$8 sps:$4 sm:$0xff]   ;;  %v3058_v50 = vld [vmem:[%s3611_s9 + $0x274] ss:$8 sps:$4 sm:$0xff]  }
  0xdd   : > { %2144 = vmatprep.subr.bf16.mxu0 %v2977_v51  ;;  %v3061_v51 = vld [vmem:[%s3611_s9 + $0x674] ss:$8 sps:$4 sm:$0xff]  }
  0xdf   : > { %1973 = vmatpush1.bf16.msra.mxu1 %v2972_v52  ;;  %v3056_v52 = vld [vmem:[%s3611_s9 + $0x270] ss:$8 sps:$4 sm:$0xff]  }
  0xe0   : > { %2145 = vmatpush1.bf16.msra.mxu0 %v2975_v53  ;;  %1974 = vmatprep.subr.bf16.mxu1 %v2980_v54  ;;  %v3059_v53 = vld [vmem:[%s3611_s9 + $0x670] ss:$8 sps:$4 sm:$0xff]   ;;  %v3064_v54 = vld [vmem:[%s3611_s9 + $0x284] ss:$8 sps:$4 sm:$0xff]  }
  0xe1   : > { %2146 = vmatprep.subr.bf16.mxu0 %v2983_v55  ;;  %v3067_v55 = vld [vmem:[%s3611_s9 + $0x684] ss:$8 sps:$4 sm:$0xff]  }
  0xe3   : > { %1975 = vmatpush1.bf16.msra.mxu1 %v2978_v56  ;;  %v3062_v56 = vld [vmem:[%s3611_s9 + $0x280] ss:$8 sps:$4 sm:$0xff]  }
  0xe4   : > { %2147 = vmatpush1.bf16.msra.mxu0 %v2981_v57  ;;  %1976 = vmatprep.subr.bf16.mxu1 %v2986_v58  ;;  %v3065_v57 = vld [vmem:[%s3611_s9 + $0x680] ss:$8 sps:$4 sm:$0xff]   ;;  %v3070_v58 = vld [vmem:[%s3611_s9 + $0x294] ss:$8 sps:$4 sm:$0xff]  }
  0xe5   : > { %2148 = vmatprep.subr.bf16.mxu0 %v2989_v59  ;;  %v3073_v59 = vld [vmem:[%s3611_s9 + $0x694] ss:$8 sps:$4 sm:$0xff]  }
  0xe7   : > { %1977 = vmatpush1.bf16.msra.mxu1 %v2984_v60  ;;  %v3068_v60 = vld [vmem:[%s3611_s9 + $0x290] ss:$8 sps:$4 sm:$0xff]  }
  0xe8   : > { %2149 = vmatpush1.bf16.msra.mxu0 %v2987_v61  ;;  %1978 = vmatprep.subr.bf16.mxu1 %v2992_v62  ;;  %v3071_v61 = vld [vmem:[%s3611_s9 + $0x690] ss:$8 sps:$4 sm:$0xff]   ;;  %v3076_v62 = vld [vmem:[%s3611_s9 + $0x2a4] ss:$8 sps:$4 sm:$0xff]  }
  0xe9   : > { %2150 = vmatprep.subr.bf16.mxu0 %v2995_v63  ;;  %v3079_v63 = vld [vmem:[%s3611_s9 + $0x6a4] ss:$8 sps:$4 sm:$0xff]  }
  0xeb   : > { %1979 = vmatpush1.bf16.msra.mxu1 %v2990_v0  ;;  %v3074_v0 = vld [vmem:[%s3611_s9 + $0x2a0] ss:$8 sps:$4 sm:$0xff]  }
  0xec   : > { %2151 = vmatpush1.bf16.msra.mxu0 %v2993_v1  ;;  %1980 = vmatprep.subr.bf16.mxu1 %v2998_v2  ;;  %v3077_v1 = vld [vmem:[%s3611_s9 + $0x6a0] ss:$8 sps:$4 sm:$0xff]   ;;  %v3082_v2 = vld [vmem:[%s3611_s9 + $0x2b4] ss:$8 sps:$4 sm:$0xff]  }
  0xed   : > { %2152 = vmatprep.subr.bf16.mxu0 %v3001_v3  ;;  %v3085_v3 = vld [vmem:[%s3611_s9 + $0x6b4] ss:$8 sps:$4 sm:$0xff]  }
  0xef   : > { %1981 = vmatpush1.bf16.msra.mxu1 %v2996_v4  ;;  %v3080_v4 = vld [vmem:[%s3611_s9 + $0x2b0] ss:$8 sps:$4 sm:$0xff]  }
  0xf0   : > { %2153 = vmatpush1.bf16.msra.mxu0 %v2999_v5  ;;  %1982 = vmatprep.subr.bf16.mxu1 %v3004_v6  ;;  %v3083_v5 = vld [vmem:[%s3611_s9 + $0x6b0] ss:$8 sps:$4 sm:$0xff]   ;;  %v3088_v6 = vld [vmem:[%s3611_s9 + $0x2c4] ss:$8 sps:$4 sm:$0xff]  }
  0xf1   : > { %2154 = vmatprep.subr.bf16.mxu0 %v3007_v7  ;;  %v3091_v7 = vld [vmem:[%s3611_s9 + $0x6c4] ss:$8 sps:$4 sm:$0xff]  }
  0xf3   : > { %1983 = vmatpush1.bf16.msra.mxu1 %v3002_v8  ;;  %v3086_v8 = vld [vmem:[%s3611_s9 + $0x2c0] ss:$8 sps:$4 sm:$0xff]  }
  0xf4   : > { %2155 = vmatpush1.bf16.msra.mxu0 %v3005_v9  ;;  %1984 = vmatprep.subr.bf16.mxu1 %v3010_v10  ;;  %v3089_v9 = vld [vmem:[%s3611_s9 + $0x6c0] ss:$8 sps:$4 sm:$0xff]   ;;  %v3094_v10 = vld [vmem:[%s3611_s9 + $0x2d4] ss:$8 sps:$4 sm:$0xff]  }
  0xf5   : > { %2156 = vmatprep.subr.bf16.mxu0 %v3013_v11  ;;  %v3097_v11 = vld [vmem:[%s3611_s9 + $0x6d4] ss:$8 sps:$4 sm:$0xff]  }
  0xf7   : > { %1985 = vmatpush1.bf16.msra.mxu1 %v3008_v12  ;;  %v3092_v12 = vld [vmem:[%s3611_s9 + $0x2d0] ss:$8 sps:$4 sm:$0xff]  }
  0xf8   : > { %2157 = vmatpush1.bf16.msra.mxu0 %v3011_v13  ;;  %1997 = vmatprep.subr.bf16.mxu1 %v3016_v14  ;;  %v3095_v13 = vld [vmem:[%s3611_s9 + $0x6d0] ss:$8 sps:$4 sm:$0xff]   ;;  %v3100_v14 = vld [vmem:[%s3611_s9 + $0x2e4] ss:$8 sps:$4 sm:$0xff]  }
  0xf9   : > { %2169 = vmatprep.subr.bf16.mxu0 %v3019_v15  ;;  %v3103_v15 = vld [vmem:[%s3611_s9 + $0x6e4] ss:$8 sps:$4 sm:$0xff]  }
  0xfa   : > { %1987 = vmatmul.mubr.bf16.vlgmr.msra.gmra.mrb[0].mxu1 %v2422_v16  ;;  %v3098_v16 = vld [vmem:[%s3611_s9 + $0x2e0] ss:$8 sps:$4 sm:$0xff]  }
  0xfb   : > { %2159 = vmatmul.mubr.bf16.vlgmr.msra.gmra.mrb[0].mxu0 %v2430_v18  ;;  %1998 = vmatpush1.bf16.msra.mxu1 %v3014_v17  ;;  %v3101_v17 = vld [vmem:[%s3611_s9 + $0x6e0] ss:$8 sps:$4 sm:$0xff]   ;;  %v3106_v18 = vld [vmem:[%s3611_s9 + $0x2f4] ss:$8 sps:$4 sm:$0xff]  }
  0xfc   : > { %2170 = vmatpush1.bf16.msra.mxu0 %v3017_v19  ;;  %1999 = vmatprep.subr.bf16.mxu1 %v3022_v20  ;;  %v3109_v19 = vld [vmem:[%s3611_s9 + $0x6f4] ss:$8 sps:$4 sm:$0xff]   ;;  %v3104_v20 = vld [vmem:[%s3611_s9 + $0x2f0] ss:$8 sps:$4 sm:$0xff]  }
  0xfd   : > { %2171 = vmatprep.subr.bf16.mxu0 %v3025_v21  ;;  %2029 = vmatprep.mubr.bf16.mxu1 %v2425_v28  ;;  %v3107_v21 = vld [vmem:[%s3611_s9 + $0x6f0] ss:$8 sps:$4 sm:$0xff]   ;;  %v2432_v28 = vcombine.low %v3777_v29, %v3779_v30 }
  0xfe   : > { %2201 = vmatprep.mubr.bf16.mxu0 %v2433_v31  ;;  %v3845_v31 = vld [vmem:[#allocation2 + $0x58] sm:$0xff] }
  0xff   : > { %2000 = vmatpush1.bf16.msra.mxu1 %v3020_v22  ;;  %v3112_v22 = vld [vmem:[%s3611_s9 + $0x304] ss:$8 sps:$4 sm:$0xff]  }
 0x100   : > { %2172 = vmatpush1.bf16.msra.mxu0 %v3023_v23  ;;  %2001 = vmatprep.subr.bf16.mxu1 %v3028_v26  ;;  %v3115_v23 = vld [vmem:[%s3611_s9 + $0x704] ss:$8 sps:$4 sm:$0xff]   ;;  %v3839_v26 = vld [vmem:[#allocation2 + $0x18] sm:$0xff] }
 0x101   : > { %2173 = vmatprep.subr.bf16.mxu0 %v3031_v27  ;;  %v2424_v27 = vcombine.low %v3769_v24, %v3771_v25  ;;  %v3118_v24 = vld [vmem:[%s3611_s9 + $0x314] ss:$8 sps:$4 sm:$0xff]   ;;  %v2427_v29 = vcombine.high %v3839_v26, %v3845_v31 }
 0x102   : > { %v3121_v25 = vld [vmem:[%s3611_s9 + $0x714] ss:$8 sps:$4 sm:$0xff]  }
 0x103   : > { %2002 = vmatpush1.bf16.msra.mxu1 %v3026_v32  ;;  %v3847_v32 = vld [vmem:[#allocation2 + $0x38] sm:$0xff] }
 0x104   : > { %2174 = vmatpush1.bf16.msra.mxu0 %v3029_v33  ;;  %2003 = vmatprep.subr.bf16.mxu1 %v3034_v34  ;;  %v3849_v33 = vld [vmem:[#allocation2 + $0x78] sm:$0xff]  ;;  %v3110_v34 = vld [vmem:[%s3611_s9 + $0x300] ss:$8 sps:$4 sm:$0xff]  }
 0x105   : > { %2175 = vmatprep.subr.bf16.mxu0 %v3037_v35  ;;  %v3113_v35 = vld [vmem:[%s3611_s9 + $0x700] ss:$8 sps:$4 sm:$0xff]   ;;  %v2435_v30 = vcombine.high %v3847_v32, %v3849_v33 }
 0x107   : > { %2004 = vmatpush1.bf16.msra.mxu1 %v3032_v36  ;;  %v3116_v36 = vld [vmem:[%s3611_s9 + $0x310] ss:$8 sps:$4 sm:$0xff]  }
 0x108   : > { %2176 = vmatpush1.bf16.msra.mxu0 %v3035_v37  ;;  %2005 = vmatprep.subr.bf16.mxu1 %v3040_v38  ;;  %v3119_v37 = vld [vmem:[%s3611_s9 + $0x710] ss:$8 sps:$4 sm:$0xff]   ;;  %v3124_v38 = vld [vmem:[%s3611_s9 + $0x324] ss:$8 sps:$4 sm:$0xff]  }
 0x109   : > { %2177 = vmatprep.subr.bf16.mxu0 %v3043_v39  ;;  %v3127_v39 = vld [vmem:[%s3611_s9 + $0x724] ss:$8 sps:$4 sm:$0xff]  }
 0x10b   : > { %2006 = vmatpush1.bf16.msra.mxu1 %v3038_v40  ;;  %v3122_v40 = vld [vmem:[%s3611_s9 + $0x320] ss:$8 sps:$4 sm:$0xff]  }
 0x10c   : > { %2178 = vmatpush1.bf16.msra.mxu0 %v3041_v41  ;;  %2007 = vmatprep.subr.bf16.mxu1 %v3046_v42  ;;  %v3125_v41 = vld [vmem:[%s3611_s9 + $0x720] ss:$8 sps:$4 sm:$0xff]   ;;  %v3130_v42 = vld [vmem:[%s3611_s9 + $0x334] ss:$8 sps:$4 sm:$0xff]  }
 0x10d   : > { %2179 = vmatprep.subr.bf16.mxu0 %v3049_v43  ;;  %v3133_v43 = vld [vmem:[%s3611_s9 + $0x734] ss:$8 sps:$4 sm:$0xff]  }
 0x10f   : > { %2008 = vmatpush1.bf16.msra.mxu1 %v3044_v44  ;;  %v3128_v44 = vld [vmem:[%s3611_s9 + $0x330] ss:$8 sps:$4 sm:$0xff]  }
 0x110   : > { %2180 = vmatpush1.bf16.msra.mxu0 %v3047_v45  ;;  %2009 = vmatprep.subr.bf16.mxu1 %v3052_v46  ;;  %v3131_v45 = vld [vmem:[%s3611_s9 + $0x730] ss:$8 sps:$4 sm:$0xff]   ;;  %v3136_v46 = vld [vmem:[%s3611_s9 + $0x344] ss:$8 sps:$4 sm:$0xff]  }
 0x111   : > { %2181 = vmatprep.subr.bf16.mxu0 %v3055_v47  ;;  %v3139_v47 = vld [vmem:[%s3611_s9 + $0x744] ss:$8 sps:$4 sm:$0xff]  }
 0x113   : > { %2010 = vmatpush1.bf16.msra.mxu1 %v3050_v48  ;;  %v3134_v48 = vld [vmem:[%s3611_s9 + $0x340] ss:$8 sps:$4 sm:$0xff]  }
 0x114   : > { %2182 = vmatpush1.bf16.msra.mxu0 %v3053_v49  ;;  %2011 = vmatprep.subr.bf16.mxu1 %v3058_v50  ;;  %v3137_v49 = vld [vmem:[%s3611_s9 + $0x740] ss:$8 sps:$4 sm:$0xff]   ;;  %v3142_v50 = vld [vmem:[%s3611_s9 + $0x354] ss:$8 sps:$4 sm:$0xff]  }
 0x115   : > { %2183 = vmatprep.subr.bf16.mxu0 %v3061_v51  ;;  %v3145_v51 = vld [vmem:[%s3611_s9 + $0x754] ss:$8 sps:$4 sm:$0xff]  }
 0x117   : > { %2012 = vmatpush1.bf16.msra.mxu1 %v3056_v52  ;;  %v3140_v52 = vld [vmem:[%s3611_s9 + $0x350] ss:$8 sps:$4 sm:$0xff]  }
 0x118   : > { %2184 = vmatpush1.bf16.msra.mxu0 %v3059_v53  ;;  %2013 = vmatprep.subr.bf16.mxu1 %v3064_v54  ;;  %v3143_v53 = vld [vmem:[%s3611_s9 + $0x750] ss:$8 sps:$4 sm:$0xff]   ;;  %v3148_v54 = vld [vmem:[%s3611_s9 + $0x364] ss:$8 sps:$4 sm:$0xff]  }
 0x119   : > { %2185 = vmatprep.subr.bf16.mxu0 %v3067_v55  ;;  %v3151_v55 = vld [vmem:[%s3611_s9 + $0x764] ss:$8 sps:$4 sm:$0xff]  }
 0x11b   : > { %2014 = vmatpush1.bf16.msra.mxu1 %v3062_v56  ;;  %v3146_v56 = vld [vmem:[%s3611_s9 + $0x360] ss:$8 sps:$4 sm:$0xff]  }
 0x11c   : > { %2186 = vmatpush1.bf16.msra.mxu0 %v3065_v57  ;;  %2015 = vmatprep.subr.bf16.mxu1 %v3070_v58  ;;  %v3149_v57 = vld [vmem:[%s3611_s9 + $0x760] ss:$8 sps:$4 sm:$0xff]   ;;  %v3154_v58 = vld [vmem:[%s3611_s9 + $0x374] ss:$8 sps:$4 sm:$0xff]  }
 0x11d   : > { %2187 = vmatprep.subr.bf16.mxu0 %v3073_v59  ;;  %v3157_v59 = vld [vmem:[%s3611_s9 + $0x774] ss:$8 sps:$4 sm:$0xff]  }
 0x11f   : > { %2016 = vmatpush1.bf16.msra.mxu1 %v3068_v60  ;;  %v3152_v60 = vld [vmem:[%s3611_s9 + $0x370] ss:$8 sps:$4 sm:$0xff]  }
 0x120   : > { %2188 = vmatpush1.bf16.msra.mxu0 %v3071_v61  ;;  %2017 = vmatprep.subr.bf16.mxu1 %v3076_v62  ;;  %v3155_v61 = vld [vmem:[%s3611_s9 + $0x770] ss:$8 sps:$4 sm:$0xff]   ;;  %v3160_v62 = vld [vmem:[%s3611_s9 + $0x384] ss:$8 sps:$4 sm:$0xff]  }
 0x121   : > { %2189 = vmatprep.subr.bf16.mxu0 %v3079_v63  ;;  %v3163_v63 = vld [vmem:[%s3611_s9 + $0x784] ss:$8 sps:$4 sm:$0xff]  }
 0x123   : > { %2018 = vmatpush1.bf16.msra.mxu1 %v3074_v0  ;;  %v3158_v0 = vld [vmem:[%s3611_s9 + $0x380] ss:$8 sps:$4 sm:$0xff]  }
 0x124   : > { %2190 = vmatpush1.bf16.msra.mxu0 %v3077_v1  ;;  %2019 = vmatprep.subr.bf16.mxu1 %v3082_v2  ;;  %v3161_v1 = vld [vmem:[%s3611_s9 + $0x780] ss:$8 sps:$4 sm:$0xff]   ;;  %v3166_v2 = vld [vmem:[%s3611_s9 + $0x394] ss:$8 sps:$4 sm:$0xff]  }
 0x125   : > { %2191 = vmatprep.subr.bf16.mxu0 %v3085_v3  ;;  %v3169_v3 = vld [vmem:[%s3611_s9 + $0x794] ss:$8 sps:$4 sm:$0xff]  }
 0x127   : > { %2020 = vmatpush1.bf16.msra.mxu1 %v3080_v4  ;;  %v3164_v4 = vld [vmem:[%s3611_s9 + $0x390] ss:$8 sps:$4 sm:$0xff]  }
 0x128   : > { %2192 = vmatpush1.bf16.msra.mxu0 %v3083_v5  ;;  %2021 = vmatprep.subr.bf16.mxu1 %v3088_v6  ;;  %v3167_v5 = vld [vmem:[%s3611_s9 + $0x790] ss:$8 sps:$4 sm:$0xff]   ;;  %v3172_v6 = vld [vmem:[%s3611_s9 + $0x3a4] ss:$8 sps:$4 sm:$0xff]  }
 0x129   : > { %2193 = vmatprep.subr.bf16.mxu0 %v3091_v7  ;;  %v3175_v7 = vld [vmem:[%s3611_s9 + $0x7a4] ss:$8 sps:$4 sm:$0xff]  }
 0x12b   : > { %2022 = vmatpush1.bf16.msra.mxu1 %v3086_v8  ;;  %v3170_v8 = vld [vmem:[%s3611_s9 + $0x3a0] ss:$8 sps:$4 sm:$0xff]  }
 0x12c   : > { %2194 = vmatpush1.bf16.msra.mxu0 %v3089_v9  ;;  %2023 = vmatprep.subr.bf16.mxu1 %v3094_v10  ;;  %v3173_v9 = vld [vmem:[%s3611_s9 + $0x7a0] ss:$8 sps:$4 sm:$0xff]   ;;  %v3178_v10 = vld [vmem:[%s3611_s9 + $0x3b4] ss:$8 sps:$4 sm:$0xff]  }
 0x12d   : > { %2195 = vmatprep.subr.bf16.mxu0 %v3097_v11  ;;  %v3181_v11 = vld [vmem:[%s3611_s9 + $0x7b4] ss:$8 sps:$4 sm:$0xff]  }
 0x12f   : > { %2024 = vmatpush1.bf16.msra.mxu1 %v3092_v12  ;;  %v3176_v12 = vld [vmem:[%s3611_s9 + $0x3b0] ss:$8 sps:$4 sm:$0xff]  }
 0x130   : > { %2196 = vmatpush1.bf16.msra.mxu0 %v3095_v13  ;;  %2025 = vmatprep.subr.bf16.mxu1 %v3100_v14  ;;  %v3179_v13 = vld [vmem:[%s3611_s9 + $0x7b0] ss:$8 sps:$4 sm:$0xff]   ;;  %v3184_v14 = vld [vmem:[%s3611_s9 + $0x3c4] ss:$8 sps:$4 sm:$0xff]  }
 0x131   : > { %2197 = vmatprep.subr.bf16.mxu0 %v3103_v15  ;;  %v3187_v15 = vld [vmem:[%s3611_s9 + $0x7c4] ss:$8 sps:$4 sm:$0xff]  }
 0x133   : > { %2026 = vmatpush1.bf16.msra.mxu1 %v3098_v16  ;;  %v3182_v16 = vld [vmem:[%s3611_s9 + $0x3c0] ss:$8 sps:$4 sm:$0xff]  }
 0x134   : > { %2198 = vmatpush1.bf16.msra.mxu0 %v3101_v17  ;;  %2027 = vmatprep.subr.bf16.mxu1 %v3106_v18  ;;  %v3185_v17 = vld [vmem:[%s3611_s9 + $0x7c0] ss:$8 sps:$4 sm:$0xff]   ;;  %v3190_v18 = vld [vmem:[%s3611_s9 + $0x3d4] ss:$8 sps:$4 sm:$0xff]  }
 0x135   : > { %2199 = vmatprep.subr.bf16.mxu0 %v3109_v19  ;;  %v3193_v19 = vld [vmem:[%s3611_s9 + $0x7d4] ss:$8 sps:$4 sm:$0xff]  }
 0x137   : > { %2028 = vmatpush1.bf16.msra.mxu1 %v3104_v20  ;;  %v3188_v20 = vld [vmem:[%s3611_s9 + $0x3d0] ss:$8 sps:$4 sm:$0xff]  }
 0x138   : > { %2200 = vmatpush1.bf16.msra.mxu0 %v3107_v21  ;;  %2040 = vmatprep.subr.bf16.mxu1 %v3112_v22  ;;  %v3191_v21 = vld [vmem:[%s3611_s9 + $0x7d0] ss:$8 sps:$4 sm:$0xff]   ;;  %v3196_v22 = vld [vmem:[%s3611_s9 + $0x3e4] ss:$8 sps:$4 sm:$0xff]  }
 0x139   : > { %2212 = vmatprep.subr.bf16.mxu0 %v3115_v23  ;;  %v3199_v23 = vld [vmem:[%s3611_s9 + $0x7e4] ss:$8 sps:$4 sm:$0xff]  }
 0x13a   : > { %2030 = vmatmul.mubr.bf16.vlgmr.msra.gmra.mrb[0].mxu1 %v2424_v27  ;;  %v3194_v27 = vld [vmem:[%s3611_s9 + $0x3e0] ss:$8 sps:$4 sm:$0xff]  }
 0x13b   : > { %2202 = vmatmul.mubr.bf16.vlgmr.msra.gmra.mrb[0].mxu0 %v2432_v28  ;;  %2041 = vmatpush1.bf16.msra.mxu1 %v3110_v34  ;;  %v3197_v28 = vld [vmem:[%s3611_s9 + $0x7e0] ss:$8 sps:$4 sm:$0xff]   ;;  %v3202_v34 = vld [vmem:[%s3611_s9 + $0x3f4] ss:$8 sps:$4 sm:$0xff]  }
 0x13c   : > { %2213 = vmatpush1.bf16.msra.mxu0 %v3113_v35  ;;  %2042 = vmatprep.subr.bf16.mxu1 %v3118_v24  ;;  %v3205_v35 = vld [vmem:[%s3611_s9 + $0x7f4] ss:$8 sps:$4 sm:$0xff]   ;;  %v3200_v24 = vld [vmem:[%s3611_s9 + $0x3f0] ss:$8 sps:$4 sm:$0xff]  }
 0x13d   : > { %2214 = vmatprep.subr.bf16.mxu0 %v3121_v25  ;;  %2072 = vmatprep.mubr.bf16.mxu1 %v2427_v29  ;;  %v3203_v25 = vld [vmem:[%s3611_s9 + $0x7f0] ss:$8 sps:$4 sm:$0xff]   ;;  %v2426_v29 = vcombine.low %v3839_v26, %v3845_v31 }
 0x13e   : > { %2244 = vmatprep.mubr.bf16.mxu0 %v2435_v30  ;;  %v2434_v30 = vcombine.low %v3847_v32, %v3849_v33 }
 0x13f   : > { %2043 = vmatpush1.bf16.msra.mxu1 %v3116_v36  ;;  %v541_v36 = vlaneseq }
 0x140   : > { %2215 = vmatpush1.bf16.msra.mxu0 %v3119_v37  ;;  %2044 = vmatprep.subr.bf16.mxu1 %v3124_v38 }
 0x141   : > { %2216 = vmatprep.subr.bf16.mxu0 %v3127_v39  ;;  %v542_v37 = vshrl.u32 %v541_v36, 7  ;;  %v539_v39 = vld [vmem:[%s234_s30] sm:$0x3] }
 0x143   : > { %2045 = vmatpush1.bf16.msra.mxu1 %v3122_v40  ;;  %v543_v38 = vsub.s32 0, %v542_v37  ;;  %v547_v40 = vsub.s32 1, %v542_v37 }
 0x144   : > { %2217 = vmatpush1.bf16.msra.mxu0 %v3125_v41  ;;  %2046 = vmatprep.subr.bf16.mxu1 %v3130_v42 }
 0x145   : > { %2218 = vmatprep.subr.bf16.mxu0 %v3133_v43  ;;  %v544_v41 = vrot.slane %v539_v39, %v543_v38  ;;  %v548_v42 = vrot.slane %v539_v39, %v547_v40 }
 0x147   : > { %2047 = vmatpush1.bf16.msra.mxu1 %v3128_v44 }
 0x148   : > { %2219 = vmatpush1.bf16.msra.mxu0 %v3131_v45  ;;  %2048 = vmatprep.subr.bf16.mxu1 %v3136_v46 }
 0x149   : > { %2220 = vmatprep.subr.bf16.mxu0 %v3139_v47 }
 0x14b   : > { %2049 = vmatpush1.bf16.msra.mxu1 %v3134_v48 }
 0x14c   : > { %2221 = vmatpush1.bf16.msra.mxu0 %v3137_v49  ;;  %2050 = vmatprep.subr.bf16.mxu1 %v3142_v50 }
 0x14d   : > { %2222 = vmatprep.subr.bf16.mxu0 %v3145_v51 }
 0x14f   : > { %2051 = vmatpush1.bf16.msra.mxu1 %v3140_v52 }
 0x150   : > { %2223 = vmatpush1.bf16.msra.mxu0 %v3143_v53  ;;  %2052 = vmatprep.subr.bf16.mxu1 %v3148_v54 }
 0x151   : > { %2224 = vmatprep.subr.bf16.mxu0 %v3151_v55 }
 0x153   : > { %2053 = vmatpush1.bf16.msra.mxu1 %v3146_v56 }
 0x154   : > { %2225 = vmatpush1.bf16.msra.mxu0 %v3149_v57  ;;  %2054 = vmatprep.subr.bf16.mxu1 %v3154_v58 }
 0x155   : > { %2226 = vmatprep.subr.bf16.mxu0 %v3157_v59 }
 0x157   : > { %2055 = vmatpush1.bf16.msra.mxu1 %v3152_v60 }
 0x158   : > { %2227 = vmatpush1.bf16.msra.mxu0 %v3155_v61  ;;  %2056 = vmatprep.subr.bf16.mxu1 %v3160_v62 }
 0x159   : > { %2228 = vmatprep.subr.bf16.mxu0 %v3163_v63 }
 0x15b   : > { %2057 = vmatpush1.bf16.msra.mxu1 %v3158_v0 }
 0x15c   : > { %2229 = vmatpush1.bf16.msra.mxu0 %v3161_v1  ;;  %2058 = vmatprep.subr.bf16.mxu1 %v3166_v2 }
 0x15d   : > { %2230 = vmatprep.subr.bf16.mxu0 %v3169_v3 }
 0x15f   : > { %2059 = vmatpush1.bf16.msra.mxu1 %v3164_v4 }
 0x160   : > { %2231 = vmatpush1.bf16.msra.mxu0 %v3167_v5  ;;  %2060 = vmatprep.subr.bf16.mxu1 %v3172_v6 }
 0x161   : > { %2232 = vmatprep.subr.bf16.mxu0 %v3175_v7 }
 0x163   : > { %2061 = vmatpush1.bf16.msra.mxu1 %v3170_v8 }
 0x164   : > { %2233 = vmatpush1.bf16.msra.mxu0 %v3173_v9  ;;  %2062 = vmatprep.subr.bf16.mxu1 %v3178_v10 }
 0x165   : > { %2234 = vmatprep.subr.bf16.mxu0 %v3181_v11 }
 0x167   : > { %2063 = vmatpush1.bf16.msra.mxu1 %v3176_v12 }
 0x168   : > { %2235 = vmatpush1.bf16.msra.mxu0 %v3179_v13  ;;  %2064 = vmatprep.subr.bf16.mxu1 %v3184_v14 }
 0x169   : > { %2236 = vmatprep.subr.bf16.mxu0 %v3187_v15 }
 0x16b   : > { %2065 = vmatpush1.bf16.msra.mxu1 %v3182_v16 }
 0x16c   : > { %2237 = vmatpush1.bf16.msra.mxu0 %v3185_v17  ;;  %2066 = vmatprep.subr.bf16.mxu1 %v3190_v18 }
 0x16d   : > { %2238 = vmatprep.subr.bf16.mxu0 %v3193_v19 }
 0x16f   : > { %2067 = vmatpush1.bf16.msra.mxu1 %v3188_v20 }
 0x170   : > { %2239 = vmatpush1.bf16.msra.mxu0 %v3191_v21  ;;  %2068 = vmatprep.subr.bf16.mxu1 %v3196_v22 }
 0x171   : > { %2240 = vmatprep.subr.bf16.mxu0 %v3199_v23 }
 0x173   : > { %2069 = vmatpush1.bf16.msra.mxu1 %v3194_v27 }
 0x174   : > { %2241 = vmatpush1.bf16.msra.mxu0 %v3197_v28  ;;  %2070 = vmatprep.subr.bf16.mxu1 %v3202_v34 }
 0x175   : > { %2242 = vmatprep.subr.bf16.mxu0 %v3205_v35 }
 0x177   : > { %2071 = vmatpush1.bf16.msra.mxu1 %v3200_v24 }
 0x178   : > { %2243 = vmatpush1.bf16.msra.mxu0 %v3203_v25 }
 0x17a   : > { %2073 = vmatmul.mubr.bf16.vlgmr.msra.gmra.mrb[0].mxu1 %v2426_v29 }
 0x17b   : > { %2245 = vmatmul.mubr.bf16.vlgmr.msra.gmra.mrb[0].mxu0 %v2434_v30 }
 0x24d   : > { %v2074_v43 = vpop.f32.mrb[0].mxu1 }
 0x24e   : > { %v2246_v26 = vpop.f32.mrb[0].mxu0  ;;  %v2704_v31 = vadd.f32 %v2074_v43, %v544_v41  ;;  %v2076_v44 = vpop.f32.mrb[1].mxu1 }
 0x24f   : > { %v2248_v32 = vpop.f32.mrb[1].mxu0  ;;  %v2706_v33 = vadd.f32 %v2076_v44, %v548_v42  ;;  %v2078_v45 = vpop.f32.mrb[2].mxu1 }
 0x250   : > { %v2250_v46 = vpop.f32.mrb[2].mxu0  ;;  %v2705_v47 = vadd.f32 %v2704_v31, %v2246_v26  ;;  %v2708_v48 = vadd.f32 %v2078_v45, %v544_v41  ;;  %v2080_v49 = vpop.f32.mrb[3].mxu1 }
 0x251   : > { %v2252_v50 = vpop.f32.mrb[3].mxu0  ;;  %v2707_v51 = vadd.f32 %v2706_v33, %v2248_v32  ;;  %v2710_v52 = vadd.f32 %v2080_v49, %v548_v42 }
 0x252   : > { %v2709_v53 = vadd.f32 %v2708_v48, %v2250_v46 }
 0x253   : > { %v2701_v54 = vpack.c.bf16 %v2707_v51, %v2705_v47  ;;  %v2711_v55 = vadd.f32 %v2710_v52, %v2252_v50 }
 0x255   : > { %2267 = vst [vmem:[%s261_s8] sm:$0xff] %v2701_v54  ;;  %v2702_v56 = vpack.c.bf16 %v2711_v55, %v2709_v53 }
 0x257   : > { %2268 = vst [vmem:[%s261_s8 + $0x8] sm:$0xff] %v2702_v56 }
 0x258   : > { %3307 = shalt.err (!%p3304_p7)
}
 0x259   : > { %s3308_s18 = scalar_lea.hbm %s3929_s23, 256  ;;  %s3312_s6 = scalar_lea.hbm %s3980_s3, 1024 }
 0x25a   : > { %p3309_p9 = scmp.ne.s32.totalorder %s3929_s23, %s3308_s18  ;;  %p3313_p10 = scmp.lt.u32.totalorder %s3929_s23, %s3980_s3 }
 0x25b   : > { %p3314_p2 = scmp.lt.u32.totalorder %s3312_s6, %s3308_s18  ;;  %p3316_p3 = scmp.lt.u32.totalorder %s3308_s18, %s3929_s23 }
 0x25c   : > { %p3310_p12 = pnand %p3309_p9, %p4005_p5 }
 0x25d   : > { %p3315_p0 = por %p3314_p2, %p3313_p10 }
 0x25e   : > { %p3311_p6 = pneg %p3310_p12 }
 0x25f   : > { %p3317_p1 = por %p3316_p3, %p3315_p0 }
 0x261   : > { %p3318_p11 = pnand %p3317_p1, %p3311_p6 }
 0x263   : > { %3321 = shalt.err (!%p3318_p11)
}
 0x264   : > { %s3391_s30 = smov 128   ;;  %s3392_s7 = smov 512  }
 0x265   : > { %s3393_s8 = smov 8  }
 0x266   : > { %2744 = dma.vmem_to_hbm [thread:$0]  (%p4005_p5), %s3924_s25, 256, %s3929_s23, %s2270_s11, %s3391_s30, %s3392_s7, %s3393_s8  }
 0x267 PF: > { %p2764_p13 = scmp.ge.s32.totalorder %s3380_s17, 2  ;;  %s2301_s27 = sand.u32 1, %s3360_s12  }
 0x268   : > { %p4006_p8 = scmp.ne.s32.totalorder %s3995_s4, 0  ;;  %s2302_s22 = scalar_lea.sflag [#allocation4], %s2301_s27 }
 0x26a   : > { %p2758_p4 = pnand %p2764_p13, %p4006_p8 }
 0x26c   : > { %3355 = dma.done.wait (!%p2758_p4), %s2302_s22, 256  }
 0x26d   : > { %3357 = vsyncadd (!%p2758_p4), %s2302_s22, 4294967040  ;;  %s20_s17 = sadd.s32 1, %s3380_s17   ;;  %s4007_s28 = sld [smem:[#allocation12_spill]] }
 0x26e   : > { %p17_p7 = scmp.ge.s32.totalorder %s20_s17, 6   ;;  %s4008_s12 = smov %s3364_s13 }
 0x26f   : > { %s4009_s13 = smov %s3368_s14  ;;  %s4010_s14 = smov %s3461_s24 }
 0x270   : > { %s4011_s15 = smov %s3376_s16  ;;  %19 = sbr.rel (!%p17_p7) target bundleno = 9 (0x9), region = 94 }
 0x273   : > { %s4012_s16 = smov %s4007_s28 }
 0x277   :  { %2307 = vsyncpa [#allocation3], 1 }
 0x278   :  { %2309 = vsyncpa [#allocation3 + $0x1], 1 }
 0x279   :  { %2310 = vsyncpa [#allocation6], 1 }
 0x27a   :  { %2312 = vsyncpa [#allocation6 + $0x1], 1 }
 0x27b   :  { %2313 = vsyncpa [#allocation4], 1 }
 0x27c   :  { %2315 = vsyncpa [#allocation4 + $0x1], 1 }

</bundles_post_ra>
